<compile_context>
chip_gen: v5e
topology: v5e:2x2
jax: 0.10.0
libtpu: 0.0.40
codegen_flags: <defaults>
</compile_context>

<pallas_src>
import functools
import math

import jax
import jax.numpy as jnp
from jax.experimental import pallas as pl
from jax.experimental.pallas import tpu as pltpu


# Attention-map output precision: bf16 halves the dominant HBM writeback
# (L*B*T*(T+S) elements).  Set to jnp.float32 for bit-closer parity with torch.
_ATTN_MAP_DTYPE = jnp.bfloat16

# Conservative per-call scoped-VMEM ceiling that fits every generation
# (v7x: 64 MiB / TensorCore; v5e / v6e: 128 MiB).
_VMEM_CEILING_BYTES = 56 * 1024 * 1024


# ------------------------- layer-parameter bookkeeping ------------------------

# Small per-layer (L, 1, D) vectors packed into one (L, NVEC, D) array.
_VEC_NAMES = ("pre_w", "pre_b",
              "bq1", "bk1", "bv1", "bo1", "ln1_w", "ln1_b",
              "bq2", "bk2", "bv2", "bo2", "ln2_w", "ln2_b",
              "fb2", "ln3_w", "ln3_b")
_VEC_IDX = {n: i for i, n in enumerate(_VEC_NAMES)}
_NVEC = len(_VEC_NAMES)

# Stacked matrix weights, in the order they are passed to the kernel.
_MAT_NAMES = ("wq1", "wk1", "wv1", "wo1",
              "wq2", "wk2", "wv2", "wo2",
              "fw1", "fw2")


# ----------------------------- in-kernel helpers -----------------------------

def _layer_norm(x, w, b, eps=1e-5):
    mu = jnp.mean(x, axis=-1, keepdims=True)
    var = jnp.mean((x - mu) ** 2, axis=-1, keepdims=True)
    return (x - mu) * jax.lax.rsqrt(var + eps) * w + b


def _bf16_matmul(a, w, bias=None):
    """a @ w with bf16 operands, f32 accumulation (+ optional f32 bias)."""
    out = jnp.dot(a.astype(jnp.bfloat16), w.astype(jnp.bfloat16),
                  preferred_element_type=jnp.float32)
    if bias is not None:
        out = out + bias
    return out


def _mha_bheads(xq, xkv, wq, wk, wv, bq, bk, bv, wo_heads, bo, bias,
                *, batch, num_heads, q_len, kv_len):
    """Multi-head attention on flattened (B*Tq, D) / (B*Tk, D) operands.

    Projections run as single (B*T, D) x (D, D) bf16 matmuls; scores/context
    are B-batched 3-D einsums per head (heads unrolled -- Mosaic in-kernel
    dot_general is only guaranteed for <=1 batch dim); each head's context is
    folded into the matching (hd, D) block of W_o (wo_heads: (H, hd, D) bf16).
    The softmax scale is pre-folded into wq / bq (prepare_params).
    Returns (out (B*Tq, D) f32, head-averaged attention (B, Tq, Tk) f32).
    """
    D = wq.shape[0]
    hd = D // num_heads

    q = _bf16_matmul(xq, wq, bq)                  # (B*Tq, D) f32 (pre-scaled)
    k = _bf16_matmul(xkv, wk, bk)                 # (B*Tk, D) f32
    v = _bf16_matmul(xkv, wv, bv)                 # (B*Tk, D) f32

    out = jnp.zeros((batch * q_len, D), jnp.float32)
    attn = jnp.zeros((batch, q_len, kv_len), jnp.float32)

    # TODO(synk): when head_dim < 128 the per-head K=hd contractions under-fill
    # the 256-wide MXUs of v6e/v7x; a VMEM-scratch context + single W_o matmul
    # would raise occupancy there.
    for h in range(num_heads):
        lo, hi = h * hd, (h + 1) * hd
        qh = q[:, lo:hi].reshape(batch, q_len, hd).astype(jnp.bfloat16)
        kh = k[:, lo:hi].reshape(batch, kv_len, hd).astype(jnp.bfloat16)
        vh = v[:, lo:hi].reshape(batch, kv_len, hd).astype(jnp.bfloat16)

        s = jnp.einsum("bqd,bkd->bqk", qh, kh,
                       preferred_element_type=jnp.float32)      # (B, Tq, Tk)
        if bias is not None:
            s = s + bias
        s = s - jnp.max(s, axis=-1, keepdims=True)
        p = jnp.exp(s)
        p = p * pl.reciprocal(jnp.sum(p, axis=-1, keepdims=True), approx=True)
        attn = attn + p

        ctx = jnp.einsum("bqk,bkd->bqd", p.astype(jnp.bfloat16), vh,
                         preferred_element_type=jnp.float32)    # (B, Tq, hd)
        out = out + jnp.dot(
            ctx.reshape(batch * q_len, hd).astype(jnp.bfloat16),
            wo_heads[h],
            preferred_element_type=jnp.float32)

    out = out + bo
    return out, attn * (1.0 / num_heads)


# ----------------------------- Pallas kernels --------------------------------

def _fused_decoder_kernel(num_heads, batch, tgt_len, src_len,
                          x0_ref, enc_ref, kp_ref,
                          wq1_ref, wk1_ref, wv1_ref, wo1_ref,
                          wq2_ref, wk2_ref, wv2_ref, wo2_ref,
                          fw1_ref, fw2_ref, fb1_ref, vec_ref,
                          xout_ref, a1_ref, a2_ref):
    x0 = x0_ref[...]          # (bB*T, D) f32  (target_embed slice)
    enc = enc_ref[...]        # (bB*S, D) bf16
    vec = vec_ref[0]          # (NVEC, D) f32  packed per-layer vectors

    def V(name):
        i = _VEC_IDX[name]
        return vec[i:i + 1, :]                     # (1, D), broadcasts vs (M, D)

    # Causal + key-padding bias built in-kernel (no dense (B,T,T) HBM traffic).
    row = jax.lax.broadcasted_iota(jnp.int32, (tgt_len, tgt_len), 0)
    col = jax.lax.broadcasted_iota(jnp.int32, (tgt_len, tgt_len), 1)
    causal = jnp.where(col > row, jnp.float32(-1e30), jnp.float32(0.0))
    self_bias = causal[None, :, :] + kp_ref[...]   # (bB, T, T)

    # ---- self-attention block (pre_norm, mha1, residual) ----
    xn = _layer_norm(x0, V("pre_w"), V("pre_b"))
    sa_out, a1 = _mha_bheads(xn, xn,
                             wq1_ref[0], wk1_ref[0], wv1_ref[0],
                             V("bq1"), V("bk1"), V("bv1"),
                             wo1_ref[0], V("bo1"), self_bias,
                             batch=batch, num_heads=num_heads,
                             q_len=tgt_len, kv_len=tgt_len)
    x = x0 + sa_out                                  # dropout1 -> identity (eval)

    # ---- cross-attention block (encoder memory keys are never padded) ----
    resid = x
    xn = _layer_norm(x, V("ln1_w"), V("ln1_b"))
    ca_out, a2 = _mha_bheads(xn, enc,
                             wq2_ref[0], wk2_ref[0], wv2_ref[0],
                             V("bq2"), V("bk2"), V("bv2"),
                             wo2_ref[0], V("bo2"), None,
                             batch=batch, num_heads=num_heads,
                             q_len=tgt_len, kv_len=src_len)
    x = ca_out + resid                               # dropout2 -> identity (eval)

    # ---- FFN block ----
    resid = x
    xn = _layer_norm(x, V("ln2_w"), V("ln2_b"))
    h = jnp.maximum(_bf16_matmul(xn, fw1_ref[0], fb1_ref[0]), 0.0)
    x = _bf16_matmul(h, fw2_ref[0], V("fb2")) + resid  # dropout3 -> identity
    x = _layer_norm(x, V("ln3_w"), V("ln3_b"))

    xout_ref[0] = x.astype(xout_ref.dtype)           # (bB*T, D) bf16
    a1_ref[0] = a1.astype(a1_ref.dtype)              # (bB, T, T)
    a2_ref[0] = a2.astype(a2_ref.dtype)              # (bB, T, S)


def _final_linear_kernel(x_ref, w_ref, b_ref, o_ref):
    o_ref[...] = jnp.dot(x_ref[...], w_ref[...],
                         preferred_element_type=jnp.float32) + b_ref[...]


# ----------------------------- VMEM sizing helpers -----------------------------

def _estimate_step_vmem(bB, T, S, D, d_ff):
    """Rough per-grid-step VMEM working set (double-buffered blocks + temps)."""
    f32, bf16 = 4, 2
    blocks = (bB * T * D * f32                  # x0
              + bB * S * D * bf16               # enc
              + bB * T * f32                    # key-padding bias
              + 8 * D * D * bf16                # wq/wk/wv/wo for both attns
              + 2 * D * d_ff * bf16             # fw1, fw2
              + d_ff * f32 + _NVEC * D * f32    # fb1 + packed vectors
              + bB * T * D * bf16               # xout
              + bB * T * (T + S) * 2)           # attention maps (bf16)
    interm = (4 * bB * T * D * f32              # q/k/v + running activation
              + 2 * bB * T * max(T, S) * f32    # scores + probs
              + bB * T * d_ff * f32)            # FFN hidden
    return 2 * blocks + interm


def _vmem_limit(step_bytes):
    return int(min(max(step_bytes + (8 << 20), 32 << 20), _VMEM_CEILING_BYTES))


def _pick_batch_tile(B, T, S, D, d_ff, budget=_VMEM_CEILING_BYTES):
    """Largest batch tile dividing B whose working set fits the VMEM budget."""
    for bB in range(B, 0, -1):
        if B % bB == 0 and _estimate_step_vmem(bB, T, S, D, d_ff) <= budget:
            return bB
    return 1


def _tile_size(n, cap, mult):
    """Largest multiple-of-`mult` tile <= cap dividing n; full n otherwise."""
    if n <= cap or n % mult != 0:
        return n
    t = cap - (cap % mult)
    while n % t != 0:
        t -= mult
    return max(t, mult)


# ----------------------------- host-side wrappers -----------------------------

def _stack_index_map(ndim):
    zeros = (0,) * (ndim - 1)
    return lambda l, b: (l,) + zeros


def fused_decoder_layers(x0_flat, enc_flat, kp_bias, lp, num_heads,
                         batch, tgt_len, src_len, batch_tile=None):
    """One pallas_call over (layers, batch tiles); both axes parallel."""
    L = lp["wq1"].shape[0]
    _, D = x0_flat.shape
    d_ff = lp["fw1"].shape[-1]
    B, T, S = batch, tgt_len, src_len

    bB = batch_tile if batch_tile is not None else _pick_batch_tile(B, T, S, D, d_ff)
    nb = B // bB

    in_specs = [
        pl.BlockSpec((bB * T, D), lambda l, b: (b, 0)),       # x0 batch slice
        pl.BlockSpec((bB * S, D), lambda l, b: (b, 0)),       # enc batch slice
        pl.BlockSpec((bB, 1, T), lambda l, b: (b, 0, 0)),     # key-padding bias
    ]
    args = [x0_flat, enc_flat, kp_bias]
    for name in _MAT_NAMES + ("fb1", "vecs"):
        arr = lp[name]
        args.append(arr)
        in_specs.append(
            pl.BlockSpec((1,) + arr.shape[1:], _stack_index_map(arr.ndim)))

    out_shape = (jax.ShapeDtypeStruct((L, B * T, D), jnp.bfloat16),
                 jax.ShapeDtypeStruct((L, B, T, T), _ATTN_MAP_DTYPE),
                 jax.ShapeDtypeStruct((L, B, T, S), _ATTN_MAP_DTYPE))
    out_specs = (pl.BlockSpec((1, bB * T, D), lambda l, b: (l, b, 0)),
                 pl.BlockSpec((1, bB, T, T), lambda l, b: (l, b, 0, 0)),
                 pl.BlockSpec((1, bB, T, S), lambda l, b: (l, b, 0, 0)))

    kernel = functools.partial(_fused_decoder_kernel, num_heads, bB, T, S)
    return pl.pallas_call(
        kernel,
        grid=(L, nb),
        in_specs=in_specs,
        out_specs=out_specs,
        out_shape=out_shape,
        compiler_params=pltpu.CompilerParams(
            dimension_semantics=("parallel", "parallel"),
            vmem_limit_bytes=_vmem_limit(_estimate_step_vmem(bB, T, S, D, d_ff))),
    )(*args)


def final_linear(x_flat, w, b):
    """(B*T, D) @ (D, V) + b, tiled over both M and the vocab dimension."""
    M, D = x_flat.shape
    V = w.shape[1]
    tm = _tile_size(M, 512, 8)
    tv = _tile_size(V, 2048, 128)
    block_bytes = 2 * (tm * D * x_flat.dtype.itemsize
                       + D * tv * w.dtype.itemsize
                       + tv * 4 + tm * tv * 4)
    return pl.pallas_call(
        _final_linear_kernel,
        grid=(M // tm, V // tv),
        in_specs=[pl.BlockSpec((tm, D), lambda i, j: (i, 0)),
                  pl.BlockSpec((D, tv), lambda i, j: (0, j)),
                  pl.BlockSpec((1, tv), lambda i, j: (0, j))],
        out_specs=pl.BlockSpec((tm, tv), lambda i, j: (i, j)),
        out_shape=jax.ShapeDtypeStruct((M, V), jnp.float32),
        compiler_params=pltpu.CompilerParams(
            dimension_semantics=("parallel", "parallel"),
            vmem_limit_bytes=_vmem_limit(block_bytes)),
    )(x_flat, w, b)


def decoder_forward(padded_targets, padding_mask, cross_attn_feats, prepped,
                    num_heads):
    B, T = padded_targets.shape
    S = cross_attn_feats.shape[1]
    D = prepped["embedding"].shape[1]

    # ---- plain-JAX glue: embedding lookup + positional encoding ----
    emb = jnp.take(prepped["embedding"], padded_targets, axis=0)      # (B, T, D)
    pe = prepped["pe"][:T]
    # reproduces `target_embed += self.positional_encoding(target_embed)`
    x0 = 2.0 * emb + pe[None, :, :]
    # top-level dropout -> identity (eval)

    # thin (B,1,T) key-padding bias; causal part is built inside the kernel.
    if padding_mask is not None:                                      # True = valid
        kp_bias = jnp.where(padding_mask, 0.0, -1e30).astype(jnp.float32)
    else:
        kp_bias = jnp.zeros((B, T), jnp.float32)
    kp_bias = kp_bias[:, None, :]
    # TODO(synk): fully key-masked query rows give a uniform softmax row here,
    # whereas nn.MultiheadAttention yields NaN for those (unused) rows.

    x0_flat = x0.reshape(B * T, D).astype(jnp.float32)
    enc_flat = cross_attn_feats.reshape(B * S, D).astype(jnp.bfloat16)

    xs, a_self, a_cross = fused_decoder_layers(
        x0_flat, enc_flat, kp_bias, prepped["layers"], num_heads, B, T, S)

    running_att = {}
    L = xs.shape[0]
    for i in range(L):
        running_att[f"layer{i+1}_dec_self"] = a_self[i]
        running_att[f"layer{i+1}_dec_cross"] = a_cross[i]

    # only the LAST layer's output feeds the final linear (reference quirk)
    seq_out = final_linear(xs[L - 1], prepped["final_w"], prepped["final_b"])
    return seq_out.reshape(B, T, -1), running_att


# ----------------------------- parameter construction -------------------------

def make_positional_encoding(max_len, d_model):
    position = jnp.arange(max_len, dtype=jnp.float32)[:, None]
    div_term = jnp.exp(jnp.arange(0, d_model, 2, dtype=jnp.float32)
                       * (-math.log(10000.0) / d_model))
    pe = jnp.zeros((max_len, d_model), dtype=jnp.float32)
    pe = pe.at[:, 0::2].set(jnp.sin(position * div_term))
    pe = pe.at[:, 1::2].set(jnp.cos(position * div_term))
    return pe


def init_params(key, num_layers, d_model, d_ff, vocab_size, max_len):
    L = num_layers

    def nrm(k, shape, scale=0.05):
        return scale * jax.random.normal(k, shape, dtype=jnp.float32)

    keys = jax.random.split(key, 3)
    ones = jnp.ones((L, 1, d_model), jnp.float32)
    zeros = jnp.zeros((L, 1, d_model), jnp.float32)
    wk = jax.random.split(keys[2], 10)
    layers = {
        "pre_w": ones, "pre_b": zeros,
        "wq1": nrm(wk[0], (L, d_model, d_model)),
        "wk1": nrm(wk[1], (L, d_model, d_model)),
        "wv1": nrm(wk[2], (L, d_model, d_model)),
        "bq1": zeros, "bk1": zeros, "bv1": zeros,
        "wo1": nrm(wk[3], (L, d_model, d_model)), "bo1": zeros,
        "ln1_w": ones, "ln1_b": zeros,
        "wq2": nrm(wk[4], (L, d_model, d_model)),
        "wk2": nrm(wk[5], (L, d_model, d_model)),
        "wv2": nrm(wk[6], (L, d_model, d_model)),
        "bq2": zeros, "bk2": zeros, "bv2": zeros,
        "wo2": nrm(wk[7], (L, d_model, d_model)), "bo2": zeros,
        "ln2_w": ones, "ln2_b": zeros,
        "fw1": nrm(wk[8], (L, d_model, d_ff)),
        "fb1": jnp.zeros((L, 1, d_ff), jnp.float32),
        "fw2": nrm(wk[9], (L, d_ff, d_model)),
        "fb2": zeros,
        "ln3_w": ones, "ln3_b": zeros,
    }
    return {
        "embedding": nrm(keys[0], (vocab_size, d_model), 0.1),
        "pe": make_positional_encoding(max_len, d_model),
        "final_w": nrm(keys[1], (d_model, vocab_size)),
        "final_b": jnp.zeros((1, vocab_size), jnp.float32),
        "layers": layers,
    }


def prepare_params(params, num_heads):
    """One-time (outside jit) weight prep: bf16 cast, scale fold, vec packing."""
    lp = dict(params["layers"])
    L, D, _ = lp["wq1"].shape
    hd = D // num_heads
    scale = 1.0 / math.sqrt(hd)

    # fold the softmax scale into the q projection (strictly free)
    lp["wq1"] = lp["wq1"] * scale
    lp["bq1"] = lp["bq1"] * scale
    lp["wq2"] = lp["wq2"] * scale
    lp["bq2"] = lp["bq2"] * scale

    prepped = {}
    for n in ("wq1", "wk1", "wv1", "wq2", "wk2", "wv2", "fw1", "fw2"):
        prepped[n] = lp[n].astype(jnp.bfloat16)
    for n in ("wo1", "wo2"):
        # per-head blocks become leading-dim slices: (L, H, hd, D) bf16
        prepped[n] = lp[n].reshape(L, num_heads, hd, D).astype(jnp.bfloat16)
    prepped["fb1"] = lp["fb1"].astype(jnp.float32)
    prepped["vecs"] = jnp.concatenate([lp[n] for n in _VEC_NAMES], axis=1)

    return {
        "embedding": params["embedding"],
        "pe": params["pe"],
        "final_w": params["final_w"].astype(jnp.bfloat16),
        "final_b": params["final_b"],
        "layers": prepped,
    }


# ----------------------------- main -------------------------------------------

if __name__ == "__main__":
    # small shapes consistent with the module
    B, T, S = 2, 8, 8
    d_model, num_heads, d_ff = 32, 4, 64
    num_layers = 2
    vocab_size = 64
    max_len = 1024

    key = jax.random.PRNGKey(0)
    k_tok, k_feat, k_par = jax.random.split(key, 3)

    padded_targets = jax.random.randint(k_tok, (B, T), 0, vocab_size,
                                        dtype=jnp.int32)
    # padding_mask: True = valid token; trailing padding for second example
    lengths = jnp.array([T, 6], dtype=jnp.int32)
    padding_mask = jnp.arange(T)[None, :] < lengths[:, None]
    cross_attn_feats = 0.1 * jax.random.normal(k_feat, (B, S, d_model),
                                               dtype=jnp.float32)

    params = init_params(k_par, num_layers, d_model, d_ff, vocab_size, max_len)
    prepped = prepare_params(params, num_heads)   # one-time bf16 cast / fold / pack

    fwd = jax.jit(functools.partial(decoder_forward, num_heads=num_heads))
    seq_out, running_att = fwd(padded_targets, padding_mask,
                               cross_attn_feats, prepped)
    jax.block_until_ready(seq_out)
    for v in running_att.values():
        jax.block_until_ready(v)

    assert seq_out.shape == (B, T, vocab_size)
    assert running_att["layer1_dec_self"].shape == (B, T, T)
    assert running_att["layer1_dec_cross"].shape == (B, T, S)
    assert running_att["layer2_dec_self"].shape == (B, T, T)
    assert bool(jnp.all(jnp.isfinite(seq_out)))
    print("KERNEL_OK")
</pallas_src>

<mosaic_0001>
module attributes {stable_mosaic.version = 11 : i64} {
  func.func @_final_linear_kernel(%arg0: i32, %arg1: i32, %arg2: memref<16x32xbf16, #tpu.memory_space<vmem>>, %arg3: memref<32x64xbf16, #tpu.memory_space<vmem>>, %arg4: memref<1x64xf32, #tpu.memory_space<vmem>>, %arg5: memref<16x64xf32, #tpu.memory_space<vmem>>) attributes {dimension_semantics = [#tpu.dimension_semantics<parallel>, #tpu.dimension_semantics<parallel>], iteration_bounds = array<i64: 1, 1>, scalar_prefetch = 0 : i64, scratch_operands = 0 : i64, tpu.core_type = #tpu.core_type<tc>, window_params = [{transform_indices = @transform_0, window_bounds = array<i64: 16, 32>}, {transform_indices = @transform_1, window_bounds = array<i64: 32, 64>}, {transform_indices = @transform_2, window_bounds = array<i64: 1, 64>}, {transform_indices = @transform_3, window_bounds = array<i64: 16, 64>}]} {
    %c0 = arith.constant 0 : index
    %c0_0 = arith.constant 0 : index
    %0 = vector.load %arg2[%c0, %c0_0] : memref<16x32xbf16, #tpu.memory_space<vmem>>, vector<16x32xbf16>
    %c0_1 = arith.constant 0 : index
    %c0_2 = arith.constant 0 : index
    %1 = vector.load %arg3[%c0_1, %c0_2] : memref<32x64xbf16, #tpu.memory_space<vmem>>, vector<32x64xbf16>
    %cst = arith.constant dense<0.000000e+00> : vector<16x64xf32>
    %2 = tpu.matmul %0, %1, %cst {dimension_numbers = #tpu.dot_dimension_numbers<[1], [0], [0], [1], [0, 0, 1, 1], [], []>} : vector<16x32xbf16>, vector<32x64xbf16>, vector<16x64xf32> -> vector<16x64xf32>
    %c0_3 = arith.constant 0 : index
    %c0_4 = arith.constant 0 : index
    %3 = vector.load %arg4[%c0_3, %c0_4] : memref<1x64xf32, #tpu.memory_space<vmem>>, vector<1x64xf32>
    %4 = vector.broadcast %3 : vector<1x64xf32> to vector<16x64xf32>
    %5 = arith.addf %2, %4 : vector<16x64xf32>
    %c0_5 = arith.constant 0 : index
    %c0_6 = arith.constant 0 : index
    %6 = vector.load %arg5[%c0_5, %c0_6] : memref<16x64xf32, #tpu.memory_space<vmem>>, vector<16x64xf32>
    tpu.vector_store %arg5[%c0_5, %c0_6], %5 {strides = array<i32>} : memref<16x64xf32, #tpu.memory_space<vmem>>, vector<16x64xf32>,
    return
  }
  func.func @transform_0(%arg0: i32, %arg1: i32) -> (i32, i32) {
    %c0_i32 = arith.constant 0 : i32
    %c0_i32_0 = arith.constant 0 : i32
    return %arg0, %c0_i32 : i32, i32
  }
  func.func @transform_1(%arg0: i32, %arg1: i32) -> (i32, i32) {
    %c0_i32 = arith.constant 0 : i32
    %c0_i32_0 = arith.constant 0 : i32
    return %c0_i32, %arg1 : i32, i32
  }
  func.func @transform_2(%arg0: i32, %arg1: i32) -> (i32, i32) {
    %c0_i32 = arith.constant 0 : i32
    %c0_i32_0 = arith.constant 0 : i32
    return %c0_i32, %arg1 : i32, i32
  }
  func.func @transform_3(%arg0: i32, %arg1: i32) -> (i32, i32) {
    %c0_i32 = arith.constant 0 : i32
    return %arg0, %arg1 : i32, i32
  }
}

module attributes {stable_mosaic.version = 11 : i64} {
  func.func @_fused_decoder_kernel(%arg0: i32, %arg1: i32, %arg2: memref<16x32xf32, #tpu.memory_space<vmem>>, %arg3: memref<16x32xbf16, #tpu.memory_space<vmem>>, %arg4: memref<2x1x8xf32, #tpu.memory_space<vmem>>, %arg5: memref<1x32x32xbf16, #tpu.memory_space<vmem>>, %arg6: memref<1x32x32xbf16, #tpu.memory_space<vmem>>, %arg7: memref<1x32x32xbf16, #tpu.memory_space<vmem>>, %arg8: memref<1x4x8x32xbf16, #tpu.memory_space<vmem>>, %arg9: memref<1x32x32xbf16, #tpu.memory_space<vmem>>, %arg10: memref<1x32x32xbf16, #tpu.memory_space<vmem>>, %arg11: memref<1x32x32xbf16, #tpu.memory_space<vmem>>, %arg12: memref<1x4x8x32xbf16, #tpu.memory_space<vmem>>, %arg13: memref<1x32x64xbf16, #tpu.memory_space<vmem>>, %arg14: memref<1x64x32xbf16, #tpu.memory_space<vmem>>, %arg15: memref<1x1x64xf32, #tpu.memory_space<vmem>>, %arg16: memref<1x17x32xf32, #tpu.memory_space<vmem>>, %arg17: memref<1x16x32xbf16, #tpu.memory_space<vmem>>, %arg18: memref<1x2x8x8xbf16, #tpu.memory_space<vmem>>, %arg19: memref<1x2x8x8xbf16, #tpu.memory_space<vmem>>) attributes {dimension_semantics = [#tpu.dimension_semantics<parallel>, #tpu.dimension_semantics<parallel>], iteration_bounds = array<i64: 2, 1>, scalar_prefetch = 0 : i64, scratch_operands = 0 : i64, tpu.core_type = #tpu.core_type<tc>, window_params = [{transform_indices = @transform_0, window_bounds = array<i64: 16, 32>}, {transform_indices = @transform_1, window_bounds = array<i64: 16, 32>}, {transform_indices = @transform_2, window_bounds = array<i64: 2, 1, 8>}, {transform_indices = @transform_3, window_bounds = array<i64: 1, 32, 32>}, {transform_indices = @transform_4, window_bounds = array<i64: 1, 32, 32>}, {transform_indices = @transform_5, window_bounds = array<i64: 1, 32, 32>}, {transform_indices = @transform_6, window_bounds = array<i64: 1, 4, 8, 32>}, {transform_indices = @transform_7, window_bounds = array<i64: 1, 32, 32>}, {transform_indices = @transform_8, window_bounds = array<i64: 1, 32, 32>}, {transform_indices = @transform_9, window_bounds = array<i64: 1, 32, 32>}, {transform_indices = @transform_10, window_bounds = array<i64: 1, 4, 8, 32>}, {transform_indices = @transform_11, window_bounds = array<i64: 1, 32, 64>}, {transform_indices = @transform_12, window_bounds = array<i64: 1, 64, 32>}, {transform_indices = @transform_13, window_bounds = array<i64: 1, 1, 64>}, {transform_indices = @transform_14, window_bounds = array<i64: 1, 17, 32>}, {transform_indices = @transform_15, window_bounds = array<i64: 1, 16, 32>}, {transform_indices = @transform_16, window_bounds = array<i64: 1, 2, 8, 8>}, {transform_indices = @transform_17, window_bounds = array<i64: 1, 2, 8, 8>}]} {
    %c0 = arith.constant 0 : index
    %c0_0 = arith.constant 0 : index
    %0 = vector.load %arg2[%c0, %c0_0] : memref<16x32xf32, #tpu.memory_space<vmem>>, vector<16x32xf32>
    %c0_1 = arith.constant 0 : index
    %c0_2 = arith.constant 0 : index
    %1 = vector.load %arg3[%c0_1, %c0_2] : memref<16x32xbf16, #tpu.memory_space<vmem>>, vector<16x32xbf16>
    %c0_3 = arith.constant 0 : index
    %c0_4 = arith.constant 0 : index
    %c0_5 = arith.constant 0 : index
    %2 = vector.load %arg16[%c0_3, %c0_4, %c0_5] : memref<1x17x32xf32, #tpu.memory_space<vmem>>, vector<1x17x32xf32>
    %3 = vector.shape_cast %2 : vector<1x17x32xf32> to vector<17x32xf32>
    %4 = tpu.iota {dimensions = array<i32: 0>} : vector<8x8xi32>
    %5 = tpu.iota {dimensions = array<i32: 1>} : vector<8x8xi32>
    %6 = arith.cmpi sgt, %5, %4 : vector<8x8xi32>
    %cst = arith.constant -1.000000e+30 : f32
    %cst_6 = arith.constant 0.000000e+00 : f32
    %7 = vector.broadcast %cst : f32 to vector<8x8xf32>
    %8 = vector.broadcast %cst_6 : f32 to vector<8x8xf32>
    %9 = arith.select %6, %7, %8 : vector<8x8xi1>, vector<8x8xf32>
    %10 = vector.shape_cast %9 : vector<8x8xf32> to vector<1x8x8xf32>
    %c0_7 = arith.constant 0 : index
    %c0_8 = arith.constant 0 : index
    %c0_9 = arith.constant 0 : index
    %11 = vector.load %arg4[%c0_7, %c0_8, %c0_9] : memref<2x1x8xf32, #tpu.memory_space<vmem>>, vector<2x1x8xf32>
    %12 = vector.broadcast %10 : vector<1x8x8xf32> to vector<2x8x8xf32>
    %13 = vector.broadcast %11 : vector<2x1x8xf32> to vector<2x8x8xf32>
    %14 = arith.addf %12, %13 : vector<2x8x8xf32>
    %15 = vector.extract_strided_slice %3 {offsets = [0, 0], sizes = [1, 32], strides = [1, 1]} : vector<17x32xf32> to vector<1x32xf32>
    %16 = vector.extract_strided_slice %3 {offsets = [1, 0], sizes = [1, 32], strides = [1, 1]} : vector<17x32xf32> to vector<1x32xf32>
    %cst_10 = arith.constant dense<0.000000e+00> : vector<16xf32>
    %17 = vector.multi_reduction <add>, %0, %cst_10 [1] : vector<16x32xf32> to vector<16xf32>
    %18 = vector.shape_cast %17 : vector<16xf32> to vector<16x1xf32>
    %cst_11 = arith.constant 3.200000e+01 : f32
    %19 = vector.broadcast %cst_11 : f32 to vector<16x1xf32>
    %20 = arith.divf %18, %19 : vector<16x1xf32>
    %21 = vector.broadcast %20 : vector<16x1xf32> to vector<16x32xf32>
    %22 = arith.subf %0, %21 : vector<16x32xf32>
    %23 = arith.mulf %22, %22 : vector<16x32xf32>
    %cst_12 = arith.constant dense<0.000000e+00> : vector<16xf32>
    %24 = vector.multi_reduction <add>, %23, %cst_12 [1] : vector<16x32xf32> to vector<16xf32>
    %25 = vector.shape_cast %24 : vector<16xf32> to vector<16x1xf32>
    %cst_13 = arith.constant 3.200000e+01 : f32
    %26 = vector.broadcast %cst_13 : f32 to vector<16x1xf32>
    %27 = arith.divf %25, %26 : vector<16x1xf32>
    %28 = vector.broadcast %20 : vector<16x1xf32> to vector<16x32xf32>
    %29 = arith.subf %0, %28 : vector<16x32xf32>
    %cst_14 = arith.constant 9.99999974E-6 : f32
    %30 = vector.broadcast %cst_14 : f32 to vector<16x1xf32>
    %31 = arith.addf %27, %30 : vector<16x1xf32>
    %32 = math.rsqrt %31 : vector<16x1xf32>
    %33 = vector.broadcast %32 : vector<16x1xf32> to vector<16x32xf32>
    %34 = arith.mulf %29, %33 : vector<16x32xf32>
    %35 = vector.broadcast %15 : vector<1x32xf32> to vector<16x32xf32>
    %36 = arith.mulf %34, %35 : vector<16x32xf32>
    %37 = vector.broadcast %16 : vector<1x32xf32> to vector<16x32xf32>
    %38 = arith.addf %36, %37 : vector<16x32xf32>
    %c0_15 = arith.constant 0 : index
    %c0_16 = arith.constant 0 : index
    %c0_17 = arith.constant 0 : index
    %39 = vector.load %arg5[%c0_15, %c0_16, %c0_17] : memref<1x32x32xbf16, #tpu.memory_space<vmem>>, vector<1x32x32xbf16>
    %40 = vector.shape_cast %39 : vector<1x32x32xbf16> to vector<32x32xbf16>
    %c0_18 = arith.constant 0 : index
    %c0_19 = arith.constant 0 : index
    %c0_20 = arith.constant 0 : index
    %41 = vector.load %arg6[%c0_18, %c0_19, %c0_20] : memref<1x32x32xbf16, #tpu.memory_space<vmem>>, vector<1x32x32xbf16>
    %42 = vector.shape_cast %41 : vector<1x32x32xbf16> to vector<32x32xbf16>
    %c0_21 = arith.constant 0 : index
    %c0_22 = arith.constant 0 : index
    %c0_23 = arith.constant 0 : index
    %43 = vector.load %arg7[%c0_21, %c0_22, %c0_23] : memref<1x32x32xbf16, #tpu.memory_space<vmem>>, vector<1x32x32xbf16>
    %44 = vector.shape_cast %43 : vector<1x32x32xbf16> to vector<32x32xbf16>
    %45 = vector.extract_strided_slice %3 {offsets = [2, 0], sizes = [1, 32], strides = [1, 1]} : vector<17x32xf32> to vector<1x32xf32>
    %46 = vector.extract_strided_slice %3 {offsets = [3, 0], sizes = [1, 32], strides = [1, 1]} : vector<17x32xf32> to vector<1x32xf32>
    %47 = vector.extract_strided_slice %3 {offsets = [4, 0], sizes = [1, 32], strides = [1, 1]} : vector<17x32xf32> to vector<1x32xf32>
    %c0_24 = arith.constant 0 : index
    %c0_25 = arith.constant 0 : index
    %c0_26 = arith.constant 0 : index
    %c0_27 = arith.constant 0 : index
    %48 = vector.load %arg8[%c0_24, %c0_25, %c0_26, %c0_27] : memref<1x4x8x32xbf16, #tpu.memory_space<vmem>>, vector<1x4x8x32xbf16>
    %49 = vector.shape_cast %48 : vector<1x4x8x32xbf16> to vector<4x8x32xbf16>
    %50 = vector.extract_strided_slice %3 {offsets = [5, 0], sizes = [1, 32], strides = [1, 1]} : vector<17x32xf32> to vector<1x32xf32>
    %51 = arith.truncf %38 : vector<16x32xf32> to vector<16x32xbf16>
    %cst_28 = arith.constant dense<0.000000e+00> : vector<16x32xf32>
    %52 = tpu.matmul %51, %40, %cst_28 {dimension_numbers = #tpu.dot_dimension_numbers<[1], [0], [0], [1], [0, 0, 1, 1], [], []>} : vector<16x32xbf16>, vector<32x32xbf16>, vector<16x32xf32> -> vector<16x32xf32>
    %53 = vector.broadcast %45 : vector<1x32xf32> to vector<16x32xf32>
    %54 = arith.addf %52, %53 : vector<16x32xf32>
    %55 = arith.truncf %38 : vector<16x32xf32> to vector<16x32xbf16>
    %cst_29 = arith.constant dense<0.000000e+00> : vector<16x32xf32>
    %56 = tpu.matmul %55, %42, %cst_29 {dimension_numbers = #tpu.dot_dimension_numbers<[1], [0], [0], [1], [0, 0, 1, 1], [], []>} : vector<16x32xbf16>, vector<32x32xbf16>, vector<16x32xf32> -> vector<16x32xf32>
    %57 = vector.broadcast %46 : vector<1x32xf32> to vector<16x32xf32>
    %58 = arith.addf %56, %57 : vector<16x32xf32>
    %59 = arith.truncf %38 : vector<16x32xf32> to vector<16x32xbf16>
    %cst_30 = arith.constant dense<0.000000e+00> : vector<16x32xf32>
    %60 = tpu.matmul %59, %44, %cst_30 {dimension_numbers = #tpu.dot_dimension_numbers<[1], [0], [0], [1], [0, 0, 1, 1], [], []>} : vector<16x32xbf16>, vector<32x32xbf16>, vector<16x32xf32> -> vector<16x32xf32>
    %61 = vector.broadcast %47 : vector<1x32xf32> to vector<16x32xf32>
    %62 = arith.addf %60, %61 : vector<16x32xf32>
    %cst_31 = arith.constant 0.000000e+00 : f32
    %63 = vector.broadcast %cst_31 : f32 to vector<16x32xf32>
    %cst_32 = arith.constant 0.000000e+00 : f32
    %64 = vector.broadcast %cst_32 : f32 to vector<2x8x8xf32>
    %65 = vector.extract_strided_slice %54 {offsets = [0, 0], sizes = [16, 8], strides = [1, 1]} : vector<16x32xf32> to vector<16x8xf32>
    %66 = vector.shape_cast %65 : vector<16x8xf32> to vector<2x8x8xf32>
    %67 = arith.truncf %66 : vector<2x8x8xf32> to vector<2x8x8xbf16>
    %68 = vector.extract_strided_slice %58 {offsets = [0, 0], sizes = [16, 8], strides = [1, 1]} : vector<16x32xf32> to vector<16x8xf32>
    %69 = vector.shape_cast %68 : vector<16x8xf32> to vector<2x8x8xf32>
    %70 = arith.truncf %69 : vector<2x8x8xf32> to vector<2x8x8xbf16>
    %71 = vector.extract_strided_slice %62 {offsets = [0, 0], sizes = [16, 8], strides = [1, 1]} : vector<16x32xf32> to vector<16x8xf32>
    %72 = vector.shape_cast %71 : vector<16x8xf32> to vector<2x8x8xf32>
    %73 = arith.truncf %72 : vector<2x8x8xf32> to vector<2x8x8xbf16>
    "tpu.trace_start"() <{level = 10 : i32, message = "bqd,bkd->bqk"}> : () -> ()
    %cst_33 = arith.constant dense<0.000000e+00> : vector<2x8x8xf32>
    %74 = tpu.matmul %67, %70, %cst_33 {dimension_numbers = #tpu.dot_dimension_numbers<[2], [2], [1], [1], [0, 0, 0, 1, 1, 1], [0], [0]>} : vector<2x8x8xbf16>, vector<2x8x8xbf16>, vector<2x8x8xf32> -> vector<2x8x8xf32>
    "tpu.trace_stop"() : () -> ()
    %75 = arith.addf %74, %14 : vector<2x8x8xf32>
    %cst_34 = arith.constant dense<0xFF800000> : vector<2x8xf32>
    %76 = vector.multi_reduction <maximumf>, %75, %cst_34 [2] : vector<2x8x8xf32> to vector<2x8xf32>
    %77 = vector.shape_cast %76 : vector<2x8xf32> to vector<2x8x1xf32>
    %78 = vector.broadcast %77 : vector<2x8x1xf32> to vector<2x8x8xf32>
    %79 = arith.subf %75, %78 : vector<2x8x8xf32>
    %80 = math.exp %79 : vector<2x8x8xf32>
    %cst_35 = arith.constant dense<0.000000e+00> : vector<2x8xf32>
    %81 = vector.multi_reduction <add>, %80, %cst_35 [2] : vector<2x8x8xf32> to vector<2x8xf32>
    %82 = vector.shape_cast %81 : vector<2x8xf32> to vector<2x8x1xf32>
    %83 = tpu.reciprocal %82 {approx = true} : vector<2x8x1xf32> -> vector<2x8x1xf32>
    %84 = vector.broadcast %83 : vector<2x8x1xf32> to vector<2x8x8xf32>
    %85 = arith.mulf %80, %84 : vector<2x8x8xf32>
    %86 = arith.addf %64, %85 : vector<2x8x8xf32>
    %87 = arith.truncf %85 : vector<2x8x8xf32> to vector<2x8x8xbf16>
    "tpu.trace_start"() <{level = 10 : i32, message = "bqk,bkd->bqd"}> : () -> ()
    %cst_36 = arith.constant dense<0.000000e+00> : vector<2x8x8xf32>
    %88 = tpu.matmul %87, %73, %cst_36 {dimension_numbers = #tpu.dot_dimension_numbers<[2], [1], [1], [2], [0, 0, 0, 1, 1, 2], [0], [0]>} : vector<2x8x8xbf16>, vector<2x8x8xbf16>, vector<2x8x8xf32> -> vector<2x8x8xf32>
    "tpu.trace_stop"() : () -> ()
    %89 = vector.shape_cast %88 : vector<2x8x8xf32> to vector<16x8xf32>
    %90 = arith.truncf %89 : vector<16x8xf32> to vector<16x8xbf16>
    %91 = vector.extract_strided_slice %49 {offsets = [0, 0, 0], sizes = [1, 8, 32], strides = [1, 1, 1]} : vector<4x8x32xbf16> to vector<1x8x32xbf16>
    %92 = vector.shape_cast %91 : vector<1x8x32xbf16> to vector<8x32xbf16>
    %cst_37 = arith.constant dense<0.000000e+00> : vector<16x32xf32>
    %93 = tpu.matmul %90, %92, %cst_37 {dimension_numbers = #tpu.dot_dimension_numbers<[1], [0], [0], [1], [0, 0, 1, 1], [], []>} : vector<16x8xbf16>, vector<8x32xbf16>, vector<16x32xf32> -> vector<16x32xf32>
    %94 = arith.addf %63, %93 : vector<16x32xf32>
    %95 = vector.extract_strided_slice %54 {offsets = [0, 8], sizes = [16, 8], strides = [1, 1]} : vector<16x32xf32> to vector<16x8xf32>
    %96 = vector.shape_cast %95 : vector<16x8xf32> to vector<2x8x8xf32>
    %97 = arith.truncf %96 : vector<2x8x8xf32> to vector<2x8x8xbf16>
    %98 = vector.extract_strided_slice %58 {offsets = [0, 8], sizes = [16, 8], strides = [1, 1]} : vector<16x32xf32> to vector<16x8xf32>
    %99 = vector.shape_cast %98 : vector<16x8xf32> to vector<2x8x8xf32>
    %100 = arith.truncf %99 : vector<2x8x8xf32> to vector<2x8x8xbf16>
    %101 = vector.extract_strided_slice %62 {offsets = [0, 8], sizes = [16, 8], strides = [1, 1]} : vector<16x32xf32> to vector<16x8xf32>
    %102 = vector.shape_cast %101 : vector<16x8xf32> to vector<2x8x8xf32>
    %103 = arith.truncf %102 : vector<2x8x8xf32> to vector<2x8x8xbf16>
    "tpu.trace_start"() <{level = 10 : i32, message = "bqd,bkd->bqk"}> : () -> ()
    %cst_38 = arith.constant dense<0.000000e+00> : vector<2x8x8xf32>
    %104 = tpu.matmul %97, %100, %cst_38 {dimension_numbers = #tpu.dot_dimension_numbers<[2], [2], [1], [1], [0, 0, 0, 1, 1, 1], [0], [0]>} : vector<2x8x8xbf16>, vector<2x8x8xbf16>, vector<2x8x8xf32> -> vector<2x8x8xf32>
    "tpu.trace_stop"() : () -> ()
    %105 = arith.addf %104, %14 : vector<2x8x8xf32>
    %cst_39 = arith.constant dense<0xFF800000> : vector<2x8xf32>
    %106 = vector.multi_reduction <maximumf>, %105, %cst_39 [2] : vector<2x8x8xf32> to vector<2x8xf32>
    %107 = vector.shape_cast %106 : vector<2x8xf32> to vector<2x8x1xf32>
    %108 = vector.broadcast %107 : vector<2x8x1xf32> to vector<2x8x8xf32>
    %109 = arith.subf %105, %108 : vector<2x8x8xf32>
    %110 = math.exp %109 : vector<2x8x8xf32>
    %cst_40 = arith.constant dense<0.000000e+00> : vector<2x8xf32>
    %111 = vector.multi_reduction <add>, %110, %cst_40 [2] : vector<2x8x8xf32> to vector<2x8xf32>
    %112 = vector.shape_cast %111 : vector<2x8xf32> to vector<2x8x1xf32>
    %113 = tpu.reciprocal %112 {approx = true} : vector<2x8x1xf32> -> vector<2x8x1xf32>
    %114 = vector.broadcast %113 : vector<2x8x1xf32> to vector<2x8x8xf32>
    %115 = arith.mulf %110, %114 : vector<2x8x8xf32>
    %116 = arith.addf %86, %115 : vector<2x8x8xf32>
    %117 = arith.truncf %115 : vector<2x8x8xf32> to vector<2x8x8xbf16>
    "tpu.trace_start"() <{level = 10 : i32, message = "bqk,bkd->bqd"}> : () -> ()
    %cst_41 = arith.constant dense<0.000000e+00> : vector<2x8x8xf32>
    %118 = tpu.matmul %117, %103, %cst_41 {dimension_numbers = #tpu.dot_dimension_numbers<[2], [1], [1], [2], [0, 0, 0, 1, 1, 2], [0], [0]>} : vector<2x8x8xbf16>, vector<2x8x8xbf16>, vector<2x8x8xf32> -> vector<2x8x8xf32>
    "tpu.trace_stop"() : () -> ()
    %119 = vector.shape_cast %118 : vector<2x8x8xf32> to vector<16x8xf32>
    %120 = arith.truncf %119 : vector<16x8xf32> to vector<16x8xbf16>
    %121 = vector.extract_strided_slice %49 {offsets = [1, 0, 0], sizes = [1, 8, 32], strides = [1, 1, 1]} : vector<4x8x32xbf16> to vector<1x8x32xbf16>
    %122 = vector.shape_cast %121 : vector<1x8x32xbf16> to vector<8x32xbf16>
    %cst_42 = arith.constant dense<0.000000e+00> : vector<16x32xf32>
    %123 = tpu.matmul %120, %122, %cst_42 {dimension_numbers = #tpu.dot_dimension_numbers<[1], [0], [0], [1], [0, 0, 1, 1], [], []>} : vector<16x8xbf16>, vector<8x32xbf16>, vector<16x32xf32> -> vector<16x32xf32>
    %124 = arith.addf %94, %123 : vector<16x32xf32>
    %125 = vector.extract_strided_slice %54 {offsets = [0, 16], sizes = [16, 8], strides = [1, 1]} : vector<16x32xf32> to vector<16x8xf32>
    %126 = vector.shape_cast %125 : vector<16x8xf32> to vector<2x8x8xf32>
    %127 = arith.truncf %126 : vector<2x8x8xf32> to vector<2x8x8xbf16>
    %128 = vector.extract_strided_slice %58 {offsets = [0, 16], sizes = [16, 8], strides = [1, 1]} : vector<16x32xf32> to vector<16x8xf32>
    %129 = vector.shape_cast %128 : vector<16x8xf32> to vector<2x8x8xf32>
    %130 = arith.truncf %129 : vector<2x8x8xf32> to vector<2x8x8xbf16>
    %131 = vector.extract_strided_slice %62 {offsets = [0, 16], sizes = [16, 8], strides = [1, 1]} : vector<16x32xf32> to vector<16x8xf32>
    %132 = vector.shape_cast %131 : vector<16x8xf32> to vector<2x8x8xf32>
    %133 = arith.truncf %132 : vector<2x8x8xf32> to vector<2x8x8xbf16>
    "tpu.trace_start"() <{level = 10 : i32, message = "bqd,bkd->bqk"}> : () -> ()
    %cst_43 = arith.constant dense<0.000000e+00> : vector<2x8x8xf32>
    %134 = tpu.matmul %127, %130, %cst_43 {dimension_numbers = #tpu.dot_dimension_numbers<[2], [2], [1], [1], [0, 0, 0, 1, 1, 1], [0], [0]>} : vector<2x8x8xbf16>, vector<2x8x8xbf16>, vector<2x8x8xf32> -> vector<2x8x8xf32>
    "tpu.trace_stop"() : () -> ()
    %135 = arith.addf %134, %14 : vector<2x8x8xf32>
    %cst_44 = arith.constant dense<0xFF800000> : vector<2x8xf32>
    %136 = vector.multi_reduction <maximumf>, %135, %cst_44 [2] : vector<2x8x8xf32> to vector<2x8xf32>
    %137 = vector.shape_cast %136 : vector<2x8xf32> to vector<2x8x1xf32>
    %138 = vector.broadcast %137 : vector<2x8x1xf32> to vector<2x8x8xf32>
    %139 = arith.subf %135, %138 : vector<2x8x8xf32>
    %140 = math.exp %139 : vector<2x8x8xf32>
    %cst_45 = arith.constant dense<0.000000e+00> : vector<2x8xf32>
    %141 = vector.multi_reduction <add>, %140, %cst_45 [2] : vector<2x8x8xf32> to vector<2x8xf32>
    %142 = vector.shape_cast %141 : vector<2x8xf32> to vector<2x8x1xf32>
    %143 = tpu.reciprocal %142 {approx = true} : vector<2x8x1xf32> -> vector<2x8x1xf32>
    %144 = vector.broadcast %143 : vector<2x8x1xf32> to vector<2x8x8xf32>
    %145 = arith.mulf %140, %144 : vector<2x8x8xf32>
    %146 = arith.addf %116, %145 : vector<2x8x8xf32>
    %147 = arith.truncf %145 : vector<2x8x8xf32> to vector<2x8x8xbf16>
    "tpu.trace_start"() <{level = 10 : i32, message = "bqk,bkd->bqd"}> : () -> ()
    %cst_46 = arith.constant dense<0.000000e+00> : vector<2x8x8xf32>
    %148 = tpu.matmul %147, %133, %cst_46 {dimension_numbers = #tpu.dot_dimension_numbers<[2], [1], [1], [2], [0, 0, 0, 1, 1, 2], [0], [0]>} : vector<2x8x8xbf16>, vector<2x8x8xbf16>, vector<2x8x8xf32> -> vector<2x8x8xf32>
    "tpu.trace_stop"() : () -> ()
    %149 = vector.shape_cast %148 : vector<2x8x8xf32> to vector<16x8xf32>
    %150 = arith.truncf %149 : vector<16x8xf32> to vector<16x8xbf16>
    %151 = vector.extract_strided_slice %49 {offsets = [2, 0, 0], sizes = [1, 8, 32], strides = [1, 1, 1]} : vector<4x8x32xbf16> to vector<1x8x32xbf16>
    %152 = vector.shape_cast %151 : vector<1x8x32xbf16> to vector<8x32xbf16>
    %cst_47 = arith.constant dense<0.000000e+00> : vector<16x32xf32>
    %153 = tpu.matmul %150, %152, %cst_47 {dimension_numbers = #tpu.dot_dimension_numbers<[1], [0], [0], [1], [0, 0, 1, 1], [], []>} : vector<16x8xbf16>, vector<8x32xbf16>, vector<16x32xf32> -> vector<16x32xf32>
    %154 = arith.addf %124, %153 : vector<16x32xf32>
    %155 = vector.extract_strided_slice %54 {offsets = [0, 24], sizes = [16, 8], strides = [1, 1]} : vector<16x32xf32> to vector<16x8xf32>
    %156 = vector.shape_cast %155 : vector<16x8xf32> to vector<2x8x8xf32>
    %157 = arith.truncf %156 : vector<2x8x8xf32> to vector<2x8x8xbf16>
    %158 = vector.extract_strided_slice %58 {offsets = [0, 24], sizes = [16, 8], strides = [1, 1]} : vector<16x32xf32> to vector<16x8xf32>
    %159 = vector.shape_cast %158 : vector<16x8xf32> to vector<2x8x8xf32>
    %160 = arith.truncf %159 : vector<2x8x8xf32> to vector<2x8x8xbf16>
    %161 = vector.extract_strided_slice %62 {offsets = [0, 24], sizes = [16, 8], strides = [1, 1]} : vector<16x32xf32> to vector<16x8xf32>
    %162 = vector.shape_cast %161 : vector<16x8xf32> to vector<2x8x8xf32>
    %163 = arith.truncf %162 : vector<2x8x8xf32> to vector<2x8x8xbf16>
    "tpu.trace_start"() <{level = 10 : i32, message = "bqd,bkd->bqk"}> : () -> ()
    %cst_48 = arith.constant dense<0.000000e+00> : vector<2x8x8xf32>
    %164 = tpu.matmul %157, %160, %cst_48 {dimension_numbers = #tpu.dot_dimension_numbers<[2], [2], [1], [1], [0, 0, 0, 1, 1, 1], [0], [0]>} : vector<2x8x8xbf16>, vector<2x8x8xbf16>, vector<2x8x8xf32> -> vector<2x8x8xf32>
    "tpu.trace_stop"() : () -> ()
    %165 = arith.addf %164, %14 : vector<2x8x8xf32>
    %cst_49 = arith.constant dense<0xFF800000> : vector<2x8xf32>
    %166 = vector.multi_reduction <maximumf>, %165, %cst_49 [2] : vector<2x8x8xf32> to vector<2x8xf32>
    %167 = vector.shape_cast %166 : vector<2x8xf32> to vector<2x8x1xf32>
    %168 = vector.broadcast %167 : vector<2x8x1xf32> to vector<2x8x8xf32>
    %169 = arith.subf %165, %168 : vector<2x8x8xf32>
    %170 = math.exp %169 : vector<2x8x8xf32>
    %cst_50 = arith.constant dense<0.000000e+00> : vector<2x8xf32>
    %171 = vector.multi_reduction <add>, %170, %cst_50 [2] : vector<2x8x8xf32> to vector<2x8xf32>
    %172 = vector.shape_cast %171 : vector<2x8xf32> to vector<2x8x1xf32>
    %173 = tpu.reciprocal %172 {approx = true} : vector<2x8x1xf32> -> vector<2x8x1xf32>
    %174 = vector.broadcast %173 : vector<2x8x1xf32> to vector<2x8x8xf32>
    %175 = arith.mulf %170, %174 : vector<2x8x8xf32>
    %176 = arith.addf %146, %175 : vector<2x8x8xf32>
    %177 = arith.truncf %175 : vector<2x8x8xf32> to vector<2x8x8xbf16>
    "tpu.trace_start"() <{level = 10 : i32, message = "bqk,bkd->bqd"}> : () -> ()
    %cst_51 = arith.constant dense<0.000000e+00> : vector<2x8x8xf32>
    %178 = tpu.matmul %177, %163, %cst_51 {dimension_numbers = #tpu.dot_dimension_numbers<[2], [1], [1], [2], [0, 0, 0, 1, 1, 2], [0], [0]>} : vector<2x8x8xbf16>, vector<2x8x8xbf16>, vector<2x8x8xf32> -> vector<2x8x8xf32>
    "tpu.trace_stop"() : () -> ()
    %179 = vector.shape_cast %178 : vector<2x8x8xf32> to vector<16x8xf32>
    %180 = arith.truncf %179 : vector<16x8xf32> to vector<16x8xbf16>
    %181 = vector.extract_strided_slice %49 {offsets = [3, 0, 0], sizes = [1, 8, 32], strides = [1, 1, 1]} : vector<4x8x32xbf16> to vector<1x8x32xbf16>
    %182 = vector.shape_cast %181 : vector<1x8x32xbf16> to vector<8x32xbf16>
    %cst_52 = arith.constant dense<0.000000e+00> : vector<16x32xf32>
    %183 = tpu.matmul %180, %182, %cst_52 {dimension_numbers = #tpu.dot_dimension_numbers<[1], [0], [0], [1], [0, 0, 1, 1], [], []>} : vector<16x8xbf16>, vector<8x32xbf16>, vector<16x32xf32> -> vector<16x32xf32>
    %184 = arith.addf %154, %183 : vector<16x32xf32>
    %185 = vector.broadcast %50 : vector<1x32xf32> to vector<16x32xf32>
    %186 = arith.addf %184, %185 : vector<16x32xf32>
    %cst_53 = arith.constant 2.500000e-01 : f32
    %187 = vector.broadcast %cst_53 : f32 to vector<2x8x8xf32>
    %188 = arith.mulf %176, %187 : vector<2x8x8xf32>
    %189 = arith.addf %0, %186 : vector<16x32xf32>
    %190 = vector.extract_strided_slice %3 {offsets = [6, 0], sizes = [1, 32], strides = [1, 1]} : vector<17x32xf32> to vector<1x32xf32>
    %191 = vector.extract_strided_slice %3 {offsets = [7, 0], sizes = [1, 32], strides = [1, 1]} : vector<17x32xf32> to vector<1x32xf32>
    %cst_54 = arith.constant dense<0.000000e+00> : vector<16xf32>
    %192 = vector.multi_reduction <add>, %189, %cst_54 [1] : vector<16x32xf32> to vector<16xf32>
    %193 = vector.shape_cast %192 : vector<16xf32> to vector<16x1xf32>
    %cst_55 = arith.constant 3.200000e+01 : f32
    %194 = vector.broadcast %cst_55 : f32 to vector<16x1xf32>
    %195 = arith.divf %193, %194 : vector<16x1xf32>
    %196 = vector.broadcast %195 : vector<16x1xf32> to vector<16x32xf32>
    %197 = arith.subf %189, %196 : vector<16x32xf32>
    %198 = arith.mulf %197, %197 : vector<16x32xf32>
    %cst_56 = arith.constant dense<0.000000e+00> : vector<16xf32>
    %199 = vector.multi_reduction <add>, %198, %cst_56 [1] : vector<16x32xf32> to vector<16xf32>
    %200 = vector.shape_cast %199 : vector<16xf32> to vector<16x1xf32>
    %cst_57 = arith.constant 3.200000e+01 : f32
    %201 = vector.broadcast %cst_57 : f32 to vector<16x1xf32>
    %202 = arith.divf %200, %201 : vector<16x1xf32>
    %203 = vector.broadcast %195 : vector<16x1xf32> to vector<16x32xf32>
    %204 = arith.subf %189, %203 : vector<16x32xf32>
    %cst_58 = arith.constant 9.99999974E-6 : f32
    %205 = vector.broadcast %cst_58 : f32 to vector<16x1xf32>
    %206 = arith.addf %202, %205 : vector<16x1xf32>
    %207 = math.rsqrt %206 : vector<16x1xf32>
    %208 = vector.broadcast %207 : vector<16x1xf32> to vector<16x32xf32>
    %209 = arith.mulf %204, %208 : vector<16x32xf32>
    %210 = vector.broadcast %190 : vector<1x32xf32> to vector<16x32xf32>
    %211 = arith.mulf %209, %210 : vector<16x32xf32>
    %212 = vector.broadcast %191 : vector<1x32xf32> to vector<16x32xf32>
    %213 = arith.addf %211, %212 : vector<16x32xf32>
    %c0_59 = arith.constant 0 : index
    %c0_60 = arith.constant 0 : index
    %c0_61 = arith.constant 0 : index
    %214 = vector.load %arg9[%c0_59, %c0_60, %c0_61] : memref<1x32x32xbf16, #tpu.memory_space<vmem>>, vector<1x32x32xbf16>
    %215 = vector.shape_cast %214 : vector<1x32x32xbf16> to vector<32x32xbf16>
    %c0_62 = arith.constant 0 : index
    %c0_63 = arith.constant 0 : index
    %c0_64 = arith.constant 0 : index
    %216 = vector.load %arg10[%c0_62, %c0_63, %c0_64] : memref<1x32x32xbf16, #tpu.memory_space<vmem>>, vector<1x32x32xbf16>
    %217 = vector.shape_cast %216 : vector<1x32x32xbf16> to vector<32x32xbf16>
    %c0_65 = arith.constant 0 : index
    %c0_66 = arith.constant 0 : index
    %c0_67 = arith.constant 0 : index
    %218 = vector.load %arg11[%c0_65, %c0_66, %c0_67] : memref<1x32x32xbf16, #tpu.memory_space<vmem>>, vector<1x32x32xbf16>
    %219 = vector.shape_cast %218 : vector<1x32x32xbf16> to vector<32x32xbf16>
    %220 = vector.extract_strided_slice %3 {offsets = [8, 0], sizes = [1, 32], strides = [1, 1]} : vector<17x32xf32> to vector<1x32xf32>
    %221 = vector.extract_strided_slice %3 {offsets = [9, 0], sizes = [1, 32], strides = [1, 1]} : vector<17x32xf32> to vector<1x32xf32>
    %222 = vector.extract_strided_slice %3 {offsets = [10, 0], sizes = [1, 32], strides = [1, 1]} : vector<17x32xf32> to vector<1x32xf32>
    %c0_68 = arith.constant 0 : index
    %c0_69 = arith.constant 0 : index
    %c0_70 = arith.constant 0 : index
    %c0_71 = arith.constant 0 : index
    %223 = vector.load %arg12[%c0_68, %c0_69, %c0_70, %c0_71] : memref<1x4x8x32xbf16, #tpu.memory_space<vmem>>, vector<1x4x8x32xbf16>
    %224 = vector.shape_cast %223 : vector<1x4x8x32xbf16> to vector<4x8x32xbf16>
    %225 = vector.extract_strided_slice %3 {offsets = [11, 0], sizes = [1, 32], strides = [1, 1]} : vector<17x32xf32> to vector<1x32xf32>
    %226 = arith.truncf %213 : vector<16x32xf32> to vector<16x32xbf16>
    %cst_72 = arith.constant dense<0.000000e+00> : vector<16x32xf32>
    %227 = tpu.matmul %226, %215, %cst_72 {dimension_numbers = #tpu.dot_dimension_numbers<[1], [0], [0], [1], [0, 0, 1, 1], [], []>} : vector<16x32xbf16>, vector<32x32xbf16>, vector<16x32xf32> -> vector<16x32xf32>
    %228 = vector.broadcast %220 : vector<1x32xf32> to vector<16x32xf32>
    %229 = arith.addf %227, %228 : vector<16x32xf32>
    %cst_73 = arith.constant dense<0.000000e+00> : vector<16x32xf32>
    %230 = tpu.matmul %1, %217, %cst_73 {dimension_numbers = #tpu.dot_dimension_numbers<[1], [0], [0], [1], [0, 0, 1, 1], [], []>} : vector<16x32xbf16>, vector<32x32xbf16>, vector<16x32xf32> -> vector<16x32xf32>
    %231 = vector.broadcast %221 : vector<1x32xf32> to vector<16x32xf32>
    %232 = arith.addf %230, %231 : vector<16x32xf32>
    %cst_74 = arith.constant dense<0.000000e+00> : vector<16x32xf32>
    %233 = tpu.matmul %1, %219, %cst_74 {dimension_numbers = #tpu.dot_dimension_numbers<[1], [0], [0], [1], [0, 0, 1, 1], [], []>} : vector<16x32xbf16>, vector<32x32xbf16>, vector<16x32xf32> -> vector<16x32xf32>
    %234 = vector.broadcast %222 : vector<1x32xf32> to vector<16x32xf32>
    %235 = arith.addf %233, %234 : vector<16x32xf32>
    %cst_75 = arith.constant 0.000000e+00 : f32
    %236 = vector.broadcast %cst_75 : f32 to vector<16x32xf32>
    %cst_76 = arith.constant 0.000000e+00 : f32
    %237 = vector.broadcast %cst_76 : f32 to vector<2x8x8xf32>
    %238 = vector.extract_strided_slice %229 {offsets = [0, 0], sizes = [16, 8], strides = [1, 1]} : vector<16x32xf32> to vector<16x8xf32>
    %239 = vector.shape_cast %238 : vector<16x8xf32> to vector<2x8x8xf32>
    %240 = arith.truncf %239 : vector<2x8x8xf32> to vector<2x8x8xbf16>
    %241 = vector.extract_strided_slice %232 {offsets = [0, 0], sizes = [16, 8], strides = [1, 1]} : vector<16x32xf32> to vector<16x8xf32>
    %242 = vector.shape_cast %241 : vector<16x8xf32> to vector<2x8x8xf32>
    %243 = arith.truncf %242 : vector<2x8x8xf32> to vector<2x8x8xbf16>
    %244 = vector.extract_strided_slice %235 {offsets = [0, 0], sizes = [16, 8], strides = [1, 1]} : vector<16x32xf32> to vector<16x8xf32>
    %245 = vector.shape_cast %244 : vector<16x8xf32> to vector<2x8x8xf32>
    %246 = arith.truncf %245 : vector<2x8x8xf32> to vector<2x8x8xbf16>
    "tpu.trace_start"() <{level = 10 : i32, message = "bqd,bkd->bqk"}> : () -> ()
    %cst_77 = arith.constant dense<0.000000e+00> : vector<2x8x8xf32>
    %247 = tpu.matmul %240, %243, %cst_77 {dimension_numbers = #tpu.dot_dimension_numbers<[2], [2], [1], [1], [0, 0, 0, 1, 1, 1], [0], [0]>} : vector<2x8x8xbf16>, vector<2x8x8xbf16>, vector<2x8x8xf32> -> vector<2x8x8xf32>
    "tpu.trace_stop"() : () -> ()
    %cst_78 = arith.constant dense<0xFF800000> : vector<2x8xf32>
    %248 = vector.multi_reduction <maximumf>, %247, %cst_78 [2] : vector<2x8x8xf32> to vector<2x8xf32>
    %249 = vector.shape_cast %248 : vector<2x8xf32> to vector<2x8x1xf32>
    %250 = vector.broadcast %249 : vector<2x8x1xf32> to vector<2x8x8xf32>
    %251 = arith.subf %247, %250 : vector<2x8x8xf32>
    %252 = math.exp %251 : vector<2x8x8xf32>
    %cst_79 = arith.constant dense<0.000000e+00> : vector<2x8xf32>
    %253 = vector.multi_reduction <add>, %252, %cst_79 [2] : vector<2x8x8xf32> to vector<2x8xf32>
    %254 = vector.shape_cast %253 : vector<2x8xf32> to vector<2x8x1xf32>
    %255 = tpu.reciprocal %254 {approx = true} : vector<2x8x1xf32> -> vector<2x8x1xf32>
    %256 = vector.broadcast %255 : vector<2x8x1xf32> to vector<2x8x8xf32>
    %257 = arith.mulf %252, %256 : vector<2x8x8xf32>
    %258 = arith.addf %237, %257 : vector<2x8x8xf32>
    %259 = arith.truncf %257 : vector<2x8x8xf32> to vector<2x8x8xbf16>
    "tpu.trace_start"() <{level = 10 : i32, message = "bqk,bkd->bqd"}> : () -> ()
    %cst_80 = arith.constant dense<0.000000e+00> : vector<2x8x8xf32>
    %260 = tpu.matmul %259, %246, %cst_80 {dimension_numbers = #tpu.dot_dimension_numbers<[2], [1], [1], [2], [0, 0, 0, 1, 1, 2], [0], [0]>} : vector<2x8x8xbf16>, vector<2x8x8xbf16>, vector<2x8x8xf32> -> vector<2x8x8xf32>
    "tpu.trace_stop"() : () -> ()
    %261 = vector.shape_cast %260 : vector<2x8x8xf32> to vector<16x8xf32>
    %262 = arith.truncf %261 : vector<16x8xf32> to vector<16x8xbf16>
    %263 = vector.extract_strided_slice %224 {offsets = [0, 0, 0], sizes = [1, 8, 32], strides = [1, 1, 1]} : vector<4x8x32xbf16> to vector<1x8x32xbf16>
    %264 = vector.shape_cast %263 : vector<1x8x32xbf16> to vector<8x32xbf16>
    %cst_81 = arith.constant dense<0.000000e+00> : vector<16x32xf32>
    %265 = tpu.matmul %262, %264, %cst_81 {dimension_numbers = #tpu.dot_dimension_numbers<[1], [0], [0], [1], [0, 0, 1, 1], [], []>} : vector<16x8xbf16>, vector<8x32xbf16>, vector<16x32xf32> -> vector<16x32xf32>
    %266 = arith.addf %236, %265 : vector<16x32xf32>
    %267 = vector.extract_strided_slice %229 {offsets = [0, 8], sizes = [16, 8], strides = [1, 1]} : vector<16x32xf32> to vector<16x8xf32>
    %268 = vector.shape_cast %267 : vector<16x8xf32> to vector<2x8x8xf32>
    %269 = arith.truncf %268 : vector<2x8x8xf32> to vector<2x8x8xbf16>
    %270 = vector.extract_strided_slice %232 {offsets = [0, 8], sizes = [16, 8], strides = [1, 1]} : vector<16x32xf32> to vector<16x8xf32>
    %271 = vector.shape_cast %270 : vector<16x8xf32> to vector<2x8x8xf32>
    %272 = arith.truncf %271 : vector<2x8x8xf32> to vector<2x8x8xbf16>
    %273 = vector.extract_strided_slice %235 {offsets = [0, 8], sizes = [16, 8], strides = [1, 1]} : vector<16x32xf32> to vector<16x8xf32>
    %274 = vector.shape_cast %273 : vector<16x8xf32> to vector<2x8x8xf32>
    %275 = arith.truncf %274 : vector<2x8x8xf32> to vector<2x8x8xbf16>
    "tpu.trace_start"() <{level = 10 : i32, message = "bqd,bkd->bqk"}> : () -> ()
    %cst_82 = arith.constant dense<0.000000e+00> : vector<2x8x8xf32>
    %276 = tpu.matmul %269, %272, %cst_82 {dimension_numbers = #tpu.dot_dimension_numbers<[2], [2], [1], [1], [0, 0, 0, 1, 1, 1], [0], [0]>} : vector<2x8x8xbf16>, vector<2x8x8xbf16>, vector<2x8x8xf32> -> vector<2x8x8xf32>
    "tpu.trace_stop"() : () -> ()
    %cst_83 = arith.constant dense<0xFF800000> : vector<2x8xf32>
    %277 = vector.multi_reduction <maximumf>, %276, %cst_83 [2] : vector<2x8x8xf32> to vector<2x8xf32>
    %278 = vector.shape_cast %277 : vector<2x8xf32> to vector<2x8x1xf32>
    %279 = vector.broadcast %278 : vector<2x8x1xf32> to vector<2x8x8xf32>
    %280 = arith.subf %276, %279 : vector<2x8x8xf32>
    %281 = math.exp %280 : vector<2x8x8xf32>
    %cst_84 = arith.constant dense<0.000000e+00> : vector<2x8xf32>
    %282 = vector.multi_reduction <add>, %281, %cst_84 [2] : vector<2x8x8xf32> to vector<2x8xf32>
    %283 = vector.shape_cast %282 : vector<2x8xf32> to vector<2x8x1xf32>
    %284 = tpu.reciprocal %283 {approx = true} : vector<2x8x1xf32> -> vector<2x8x1xf32>
    %285 = vector.broadcast %284 : vector<2x8x1xf32> to vector<2x8x8xf32>
    %286 = arith.mulf %281, %285 : vector<2x8x8xf32>
    %287 = arith.addf %258, %286 : vector<2x8x8xf32>
    %288 = arith.truncf %286 : vector<2x8x8xf32> to vector<2x8x8xbf16>
    "tpu.trace_start"() <{level = 10 : i32, message = "bqk,bkd->bqd"}> : () -> ()
    %cst_85 = arith.constant dense<0.000000e+00> : vector<2x8x8xf32>
    %289 = tpu.matmul %288, %275, %cst_85 {dimension_numbers = #tpu.dot_dimension_numbers<[2], [1], [1], [2], [0, 0, 0, 1, 1, 2], [0], [0]>} : vector<2x8x8xbf16>, vector<2x8x8xbf16>, vector<2x8x8xf32> -> vector<2x8x8xf32>
    "tpu.trace_stop"() : () -> ()
    %290 = vector.shape_cast %289 : vector<2x8x8xf32> to vector<16x8xf32>
    %291 = arith.truncf %290 : vector<16x8xf32> to vector<16x8xbf16>
    %292 = vector.extract_strided_slice %224 {offsets = [1, 0, 0], sizes = [1, 8, 32], strides = [1, 1, 1]} : vector<4x8x32xbf16> to vector<1x8x32xbf16>
    %293 = vector.shape_cast %292 : vector<1x8x32xbf16> to vector<8x32xbf16>
    %cst_86 = arith.constant dense<0.000000e+00> : vector<16x32xf32>
    %294 = tpu.matmul %291, %293, %cst_86 {dimension_numbers = #tpu.dot_dimension_numbers<[1], [0], [0], [1], [0, 0, 1, 1], [], []>} : vector<16x8xbf16>, vector<8x32xbf16>, vector<16x32xf32> -> vector<16x32xf32>
    %295 = arith.addf %266, %294 : vector<16x32xf32>
    %296 = vector.extract_strided_slice %229 {offsets = [0, 16], sizes = [16, 8], strides = [1, 1]} : vector<16x32xf32> to vector<16x8xf32>
    %297 = vector.shape_cast %296 : vector<16x8xf32> to vector<2x8x8xf32>
    %298 = arith.truncf %297 : vector<2x8x8xf32> to vector<2x8x8xbf16>
    %299 = vector.extract_strided_slice %232 {offsets = [0, 16], sizes = [16, 8], strides = [1, 1]} : vector<16x32xf32> to vector<16x8xf32>
    %300 = vector.shape_cast %299 : vector<16x8xf32> to vector<2x8x8xf32>
    %301 = arith.truncf %300 : vector<2x8x8xf32> to vector<2x8x8xbf16>
    %302 = vector.extract_strided_slice %235 {offsets = [0, 16], sizes = [16, 8], strides = [1, 1]} : vector<16x32xf32> to vector<16x8xf32>
    %303 = vector.shape_cast %302 : vector<16x8xf32> to vector<2x8x8xf32>
    %304 = arith.truncf %303 : vector<2x8x8xf32> to vector<2x8x8xbf16>
    "tpu.trace_start"() <{level = 10 : i32, message = "bqd,bkd->bqk"}> : () -> ()
    %cst_87 = arith.constant dense<0.000000e+00> : vector<2x8x8xf32>
    %305 = tpu.matmul %298, %301, %cst_87 {dimension_numbers = #tpu.dot_dimension_numbers<[2], [2], [1], [1], [0, 0, 0, 1, 1, 1], [0], [0]>} : vector<2x8x8xbf16>, vector<2x8x8xbf16>, vector<2x8x8xf32> -> vector<2x8x8xf32>
    "tpu.trace_stop"() : () -> ()
    %cst_88 = arith.constant dense<0xFF800000> : vector<2x8xf32>
    %306 = vector.multi_reduction <maximumf>, %305, %cst_88 [2] : vector<2x8x8xf32> to vector<2x8xf32>
    %307 = vector.shape_cast %306 : vector<2x8xf32> to vector<2x8x1xf32>
    %308 = vector.broadcast %307 : vector<2x8x1xf32> to vector<2x8x8xf32>
    %309 = arith.subf %305, %308 : vector<2x8x8xf32>
    %310 = math.exp %309 : vector<2x8x8xf32>
    %cst_89 = arith.constant dense<0.000000e+00> : vector<2x8xf32>
    %311 = vector.multi_reduction <add>, %310, %cst_89 [2] : vector<2x8x8xf32> to vector<2x8xf32>
    %312 = vector.shape_cast %311 : vector<2x8xf32> to vector<2x8x1xf32>
    %313 = tpu.reciprocal %312 {approx = true} : vector<2x8x1xf32> -> vector<2x8x1xf32>
    %314 = vector.broadcast %313 : vector<2x8x1xf32> to vector<2x8x8xf32>
    %315 = arith.mulf %310, %314 : vector<2x8x8xf32>
    %316 = arith.addf %287, %315 : vector<2x8x8xf32>
    %317 = arith.truncf %315 : vector<2x8x8xf32> to vector<2x8x8xbf16>
    "tpu.trace_start"() <{level = 10 : i32, message = "bqk,bkd->bqd"}> : () -> ()
    %cst_90 = arith.constant dense<0.000000e+00> : vector<2x8x8xf32>
    %318 = tpu.matmul %317, %304, %cst_90 {dimension_numbers = #tpu.dot_dimension_numbers<[2], [1], [1], [2], [0, 0, 0, 1, 1, 2], [0], [0]>} : vector<2x8x8xbf16>, vector<2x8x8xbf16>, vector<2x8x8xf32> -> vector<2x8x8xf32>
    "tpu.trace_stop"() : () -> ()
    %319 = vector.shape_cast %318 : vector<2x8x8xf32> to vector<16x8xf32>
    %320 = arith.truncf %319 : vector<16x8xf32> to vector<16x8xbf16>
    %321 = vector.extract_strided_slice %224 {offsets = [2, 0, 0], sizes = [1, 8, 32], strides = [1, 1, 1]} : vector<4x8x32xbf16> to vector<1x8x32xbf16>
    %322 = vector.shape_cast %321 : vector<1x8x32xbf16> to vector<8x32xbf16>
    %cst_91 = arith.constant dense<0.000000e+00> : vector<16x32xf32>
    %323 = tpu.matmul %320, %322, %cst_91 {dimension_numbers = #tpu.dot_dimension_numbers<[1], [0], [0], [1], [0, 0, 1, 1], [], []>} : vector<16x8xbf16>, vector<8x32xbf16>, vector<16x32xf32> -> vector<16x32xf32>
    %324 = arith.addf %295, %323 : vector<16x32xf32>
    %325 = vector.extract_strided_slice %229 {offsets = [0, 24], sizes = [16, 8], strides = [1, 1]} : vector<16x32xf32> to vector<16x8xf32>
    %326 = vector.shape_cast %325 : vector<16x8xf32> to vector<2x8x8xf32>
    %327 = arith.truncf %326 : vector<2x8x8xf32> to vector<2x8x8xbf16>
    %328 = vector.extract_strided_slice %232 {offsets = [0, 24], sizes = [16, 8], strides = [1, 1]} : vector<16x32xf32> to vector<16x8xf32>
    %329 = vector.shape_cast %328 : vector<16x8xf32> to vector<2x8x8xf32>
    %330 = arith.truncf %329 : vector<2x8x8xf32> to vector<2x8x8xbf16>
    %331 = vector.extract_strided_slice %235 {offsets = [0, 24], sizes = [16, 8], strides = [1, 1]} : vector<16x32xf32> to vector<16x8xf32>
    %332 = vector.shape_cast %331 : vector<16x8xf32> to vector<2x8x8xf32>
    %333 = arith.truncf %332 : vector<2x8x8xf32> to vector<2x8x8xbf16>
    "tpu.trace_start"() <{level = 10 : i32, message = "bqd,bkd->bqk"}> : () -> ()
    %cst_92 = arith.constant dense<0.000000e+00> : vector<2x8x8xf32>
    %334 = tpu.matmul %327, %330, %cst_92 {dimension_numbers = #tpu.dot_dimension_numbers<[2], [2], [1], [1], [0, 0, 0, 1, 1, 1], [0], [0]>} : vector<2x8x8xbf16>, vector<2x8x8xbf16>, vector<2x8x8xf32> -> vector<2x8x8xf32>
    "tpu.trace_stop"() : () -> ()
    %cst_93 = arith.constant dense<0xFF800000> : vector<2x8xf32>
    %335 = vector.multi_reduction <maximumf>, %334, %cst_93 [2] : vector<2x8x8xf32> to vector<2x8xf32>
    %336 = vector.shape_cast %335 : vector<2x8xf32> to vector<2x8x1xf32>
    %337 = vector.broadcast %336 : vector<2x8x1xf32> to vector<2x8x8xf32>
    %338 = arith.subf %334, %337 : vector<2x8x8xf32>
    %339 = math.exp %338 : vector<2x8x8xf32>
    %cst_94 = arith.constant dense<0.000000e+00> : vector<2x8xf32>
    %340 = vector.multi_reduction <add>, %339, %cst_94 [2] : vector<2x8x8xf32> to vector<2x8xf32>
    %341 = vector.shape_cast %340 : vector<2x8xf32> to vector<2x8x1xf32>
    %342 = tpu.reciprocal %341 {approx = true} : vector<2x8x1xf32> -> vector<2x8x1xf32>
    %343 = vector.broadcast %342 : vector<2x8x1xf32> to vector<2x8x8xf32>
    %344 = arith.mulf %339, %343 : vector<2x8x8xf32>
    %345 = arith.addf %316, %344 : vector<2x8x8xf32>
    %346 = arith.truncf %344 : vector<2x8x8xf32> to vector<2x8x8xbf16>
    "tpu.trace_start"() <{level = 10 : i32, message = "bqk,bkd->bqd"}> : () -> ()
    %cst_95 = arith.constant dense<0.000000e+00> : vector<2x8x8xf32>
    %347 = tpu.matmul %346, %333, %cst_95 {dimension_numbers = #tpu.dot_dimension_numbers<[2], [1], [1], [2], [0, 0, 0, 1, 1, 2], [0], [0]>} : vector<2x8x8xbf16>, vector<2x8x8xbf16>, vector<2x8x8xf32> -> vector<2x8x8xf32>
    "tpu.trace_stop"() : () -> ()
    %348 = vector.shape_cast %347 : vector<2x8x8xf32> to vector<16x8xf32>
    %349 = arith.truncf %348 : vector<16x8xf32> to vector<16x8xbf16>
    %350 = vector.extract_strided_slice %224 {offsets = [3, 0, 0], sizes = [1, 8, 32], strides = [1, 1, 1]} : vector<4x8x32xbf16> to vector<1x8x32xbf16>
    %351 = vector.shape_cast %350 : vector<1x8x32xbf16> to vector<8x32xbf16>
    %cst_96 = arith.constant dense<0.000000e+00> : vector<16x32xf32>
    %352 = tpu.matmul %349, %351, %cst_96 {dimension_numbers = #tpu.dot_dimension_numbers<[1], [0], [0], [1], [0, 0, 1, 1], [], []>} : vector<16x8xbf16>, vector<8x32xbf16>, vector<16x32xf32> -> vector<16x32xf32>
    %353 = arith.addf %324, %352 : vector<16x32xf32>
    %354 = vector.broadcast %225 : vector<1x32xf32> to vector<16x32xf32>
    %355 = arith.addf %353, %354 : vector<16x32xf32>
    %cst_97 = arith.constant 2.500000e-01 : f32
    %356 = vector.broadcast %cst_97 : f32 to vector<2x8x8xf32>
    %357 = arith.mulf %345, %356 : vector<2x8x8xf32>
    %358 = arith.addf %355, %189 : vector<16x32xf32>
    %359 = vector.extract_strided_slice %3 {offsets = [12, 0], sizes = [1, 32], strides = [1, 1]} : vector<17x32xf32> to vector<1x32xf32>
    %360 = vector.extract_strided_slice %3 {offsets = [13, 0], sizes = [1, 32], strides = [1, 1]} : vector<17x32xf32> to vector<1x32xf32>
    %cst_98 = arith.constant dense<0.000000e+00> : vector<16xf32>
    %361 = vector.multi_reduction <add>, %358, %cst_98 [1] : vector<16x32xf32> to vector<16xf32>
    %362 = vector.shape_cast %361 : vector<16xf32> to vector<16x1xf32>
    %cst_99 = arith.constant 3.200000e+01 : f32
    %363 = vector.broadcast %cst_99 : f32 to vector<16x1xf32>
    %364 = arith.divf %362, %363 : vector<16x1xf32>
    %365 = vector.broadcast %364 : vector<16x1xf32> to vector<16x32xf32>
    %366 = arith.subf %358, %365 : vector<16x32xf32>
    %367 = arith.mulf %366, %366 : vector<16x32xf32>
    %cst_100 = arith.constant dense<0.000000e+00> : vector<16xf32>
    %368 = vector.multi_reduction <add>, %367, %cst_100 [1] : vector<16x32xf32> to vector<16xf32>
    %369 = vector.shape_cast %368 : vector<16xf32> to vector<16x1xf32>
    %cst_101 = arith.constant 3.200000e+01 : f32
    %370 = vector.broadcast %cst_101 : f32 to vector<16x1xf32>
    %371 = arith.divf %369, %370 : vector<16x1xf32>
    %372 = vector.broadcast %364 : vector<16x1xf32> to vector<16x32xf32>
    %373 = arith.subf %358, %372 : vector<16x32xf32>
    %cst_102 = arith.constant 9.99999974E-6 : f32
    %374 = vector.broadcast %cst_102 : f32 to vector<16x1xf32>
    %375 = arith.addf %371, %374 : vector<16x1xf32>
    %376 = math.rsqrt %375 : vector<16x1xf32>
    %377 = vector.broadcast %376 : vector<16x1xf32> to vector<16x32xf32>
    %378 = arith.mulf %373, %377 : vector<16x32xf32>
    %379 = vector.broadcast %359 : vector<1x32xf32> to vector<16x32xf32>
    %380 = arith.mulf %378, %379 : vector<16x32xf32>
    %381 = vector.broadcast %360 : vector<1x32xf32> to vector<16x32xf32>
    %382 = arith.addf %380, %381 : vector<16x32xf32>
    %c0_103 = arith.constant 0 : index
    %c0_104 = arith.constant 0 : index
    %c0_105 = arith.constant 0 : index
    %383 = vector.load %arg13[%c0_103, %c0_104, %c0_105] : memref<1x32x64xbf16, #tpu.memory_space<vmem>>, vector<1x32x64xbf16>
    %384 = vector.shape_cast %383 : vector<1x32x64xbf16> to vector<32x64xbf16>
    %c0_106 = arith.constant 0 : index
    %c0_107 = arith.constant 0 : index
    %c0_108 = arith.constant 0 : index
    %385 = vector.load %arg15[%c0_106, %c0_107, %c0_108] : memref<1x1x64xf32, #tpu.memory_space<vmem>>, vector<1x1x64xf32>
    %386 = vector.shape_cast %385 : vector<1x1x64xf32> to vector<1x64xf32>
    %387 = arith.truncf %382 : vector<16x32xf32> to vector<16x32xbf16>
    %cst_109 = arith.constant dense<0.000000e+00> : vector<16x64xf32>
    %388 = tpu.matmul %387, %384, %cst_109 {dimension_numbers = #tpu.dot_dimension_numbers<[1], [0], [0], [1], [0, 0, 1, 1], [], []>} : vector<16x32xbf16>, vector<32x64xbf16>, vector<16x64xf32> -> vector<16x64xf32>
    %389 = vector.broadcast %386 : vector<1x64xf32> to vector<16x64xf32>
    %390 = arith.addf %388, %389 : vector<16x64xf32>
    %cst_110 = arith.constant 0.000000e+00 : f32
    %391 = vector.broadcast %cst_110 : f32 to vector<16x64xf32>
    %392 = arith.maximumf %390, %391 : vector<16x64xf32>
    %c0_111 = arith.constant 0 : index
    %c0_112 = arith.constant 0 : index
    %c0_113 = arith.constant 0 : index
    %393 = vector.load %arg14[%c0_111, %c0_112, %c0_113] : memref<1x64x32xbf16, #tpu.memory_space<vmem>>, vector<1x64x32xbf16>
    %394 = vector.shape_cast %393 : vector<1x64x32xbf16> to vector<64x32xbf16>
    %395 = vector.extract_strided_slice %3 {offsets = [14, 0], sizes = [1, 32], strides = [1, 1]} : vector<17x32xf32> to vector<1x32xf32>
    %396 = arith.truncf %392 : vector<16x64xf32> to vector<16x64xbf16>
    %cst_114 = arith.constant dense<0.000000e+00> : vector<16x32xf32>
    %397 = tpu.matmul %396, %394, %cst_114 {dimension_numbers = #tpu.dot_dimension_numbers<[1], [0], [0], [1], [0, 0, 1, 1], [], []>} : vector<16x64xbf16>, vector<64x32xbf16>, vector<16x32xf32> -> vector<16x32xf32>
    %398 = vector.broadcast %395 : vector<1x32xf32> to vector<16x32xf32>
    %399 = arith.addf %397, %398 : vector<16x32xf32>
    %400 = arith.addf %399, %358 : vector<16x32xf32>
    %401 = vector.extract_strided_slice %3 {offsets = [15, 0], sizes = [1, 32], strides = [1, 1]} : vector<17x32xf32> to vector<1x32xf32>
    %402 = vector.extract_strided_slice %3 {offsets = [16, 0], sizes = [1, 32], strides = [1, 1]} : vector<17x32xf32> to vector<1x32xf32>
    %cst_115 = arith.constant dense<0.000000e+00> : vector<16xf32>
    %403 = vector.multi_reduction <add>, %400, %cst_115 [1] : vector<16x32xf32> to vector<16xf32>
    %404 = vector.shape_cast %403 : vector<16xf32> to vector<16x1xf32>
    %cst_116 = arith.constant 3.200000e+01 : f32
    %405 = vector.broadcast %cst_116 : f32 to vector<16x1xf32>
    %406 = arith.divf %404, %405 : vector<16x1xf32>
    %407 = vector.broadcast %406 : vector<16x1xf32> to vector<16x32xf32>
    %408 = arith.subf %400, %407 : vector<16x32xf32>
    %409 = arith.mulf %408, %408 : vector<16x32xf32>
    %cst_117 = arith.constant dense<0.000000e+00> : vector<16xf32>
    %410 = vector.multi_reduction <add>, %409, %cst_117 [1] : vector<16x32xf32> to vector<16xf32>
    %411 = vector.shape_cast %410 : vector<16xf32> to vector<16x1xf32>
    %cst_118 = arith.constant 3.200000e+01 : f32
    %412 = vector.broadcast %cst_118 : f32 to vector<16x1xf32>
    %413 = arith.divf %411, %412 : vector<16x1xf32>
    %414 = vector.broadcast %406 : vector<16x1xf32> to vector<16x32xf32>
    %415 = arith.subf %400, %414 : vector<16x32xf32>
    %cst_119 = arith.constant 9.99999974E-6 : f32
    %416 = vector.broadcast %cst_119 : f32 to vector<16x1xf32>
    %417 = arith.addf %413, %416 : vector<16x1xf32>
    %418 = math.rsqrt %417 : vector<16x1xf32>
    %419 = vector.broadcast %418 : vector<16x1xf32> to vector<16x32xf32>
    %420 = arith.mulf %415, %419 : vector<16x32xf32>
    %421 = vector.broadcast %401 : vector<1x32xf32> to vector<16x32xf32>
    %422 = arith.mulf %420, %421 : vector<16x32xf32>
    %423 = vector.broadcast %402 : vector<1x32xf32> to vector<16x32xf32>
    %424 = arith.addf %422, %423 : vector<16x32xf32>
    %425 = arith.truncf %424 : vector<16x32xf32> to vector<16x32xbf16>
    %c0_120 = arith.constant 0 : index
    %c0_121 = arith.constant 0 : index
    %c0_122 = arith.constant 0 : index
    %426 = vector.load %arg17[%c0_120, %c0_121, %c0_122] : memref<1x16x32xbf16, #tpu.memory_space<vmem>>, vector<1x16x32xbf16>
    %427 = vector.shape_cast %426 : vector<1x16x32xbf16> to vector<16x32xbf16>
    %428 = vector.shape_cast %425 : vector<16x32xbf16> to vector<1x16x32xbf16>
    tpu.vector_store %arg17[%c0_120, %c0_121, %c0_122], %428 {strides = array<i32>} : memref<1x16x32xbf16, #tpu.memory_space<vmem>>, vector<1x16x32xbf16>,
    %429 = arith.truncf %188 : vector<2x8x8xf32> to vector<2x8x8xbf16>
    %c0_123 = arith.constant 0 : index
    %c0_124 = arith.constant 0 : index
    %c0_125 = arith.constant 0 : index
    %c0_126 = arith.constant 0 : index
    %430 = vector.load %arg18[%c0_123, %c0_124, %c0_125, %c0_126] : memref<1x2x8x8xbf16, #tpu.memory_space<vmem>>, vector<1x2x8x8xbf16>
    %431 = vector.shape_cast %430 : vector<1x2x8x8xbf16> to vector<2x8x8xbf16>
    %432 = vector.shape_cast %429 : vector<2x8x8xbf16> to vector<1x2x8x8xbf16>
    tpu.vector_store %arg18[%c0_123, %c0_124, %c0_125, %c0_126], %432 {strides = array<i32>} : memref<1x2x8x8xbf16, #tpu.memory_space<vmem>>, vector<1x2x8x8xbf16>,
    %433 = arith.truncf %357 : vector<2x8x8xf32> to vector<2x8x8xbf16>
    %c0_127 = arith.constant 0 : index
    %c0_128 = arith.constant 0 : index
    %c0_129 = arith.constant 0 : index
    %c0_130 = arith.constant 0 : index
    %434 = vector.load %arg19[%c0_127, %c0_128, %c0_129, %c0_130] : memref<1x2x8x8xbf16, #tpu.memory_space<vmem>>, vector<1x2x8x8xbf16>
    %435 = vector.shape_cast %434 : vector<1x2x8x8xbf16> to vector<2x8x8xbf16>
    %436 = vector.shape_cast %433 : vector<2x8x8xbf16> to vector<1x2x8x8xbf16>
    tpu.vector_store %arg19[%c0_127, %c0_128, %c0_129, %c0_130], %436 {strides = array<i32>} : memref<1x2x8x8xbf16, #tpu.memory_space<vmem>>, vector<1x2x8x8xbf16>,
    return
  }
  func.func @transform_0(%arg0: i32, %arg1: i32) -> (i32, i32) {
    %c0_i32 = arith.constant 0 : i32
    %c0_i32_0 = arith.constant 0 : i32
    return %arg1, %c0_i32 : i32, i32
  }
  func.func @transform_1(%arg0: i32, %arg1: i32) -> (i32, i32) {
    %c0_i32 = arith.constant 0 : i32
    %c0_i32_0 = arith.constant 0 : i32
    return %arg1, %c0_i32 : i32, i32
  }
  func.func @transform_2(%arg0: i32, %arg1: i32) -> (i32, i32, i32) {
    %c0_i32 = arith.constant 0 : i32
    %c0_i32_0 = arith.constant 0 : i32
    %c0_i32_1 = arith.constant 0 : i32
    return %arg1, %c0_i32, %c0_i32_0 : i32, i32, i32
  }
  func.func @transform_3(%arg0: i32, %arg1: i32) -> (i32, i32, i32) {
    %c0_i32 = arith.constant 0 : i32
    %c0_i32_0 = arith.constant 0 : i32
    %c0_i32_1 = arith.constant 0 : i32
    return %arg0, %c0_i32, %c0_i32_0 : i32, i32, i32
  }
  func.func @transform_4(%arg0: i32, %arg1: i32) -> (i32, i32, i32) {
    %c0_i32 = arith.constant 0 : i32
    %c0_i32_0 = arith.constant 0 : i32
    %c0_i32_1 = arith.constant 0 : i32
    return %arg0, %c0_i32, %c0_i32_0 : i32, i32, i32
  }
  func.func @transform_5(%arg0: i32, %arg1: i32) -> (i32, i32, i32) {
    %c0_i32 = arith.constant 0 : i32
    %c0_i32_0 = arith.constant 0 : i32
    %c0_i32_1 = arith.constant 0 : i32
    return %arg0, %c0_i32, %c0_i32_0 : i32, i32, i32
  }
  func.func @transform_6(%arg0: i32, %arg1: i32) -> (i32, i32, i32, i32) {
    %c0_i32 = arith.constant 0 : i32
    %c0_i32_0 = arith.constant 0 : i32
    %c0_i32_1 = arith.constant 0 : i32
    %c0_i32_2 = arith.constant 0 : i32
    return %arg0, %c0_i32, %c0_i32_0, %c0_i32_1 : i32, i32, i32, i32
  }
  func.func @transform_7(%arg0: i32, %arg1: i32) -> (i32, i32, i32) {
    %c0_i32 = arith.constant 0 : i32
    %c0_i32_0 = arith.constant 0 : i32
    %c0_i32_1 = arith.constant 0 : i32
    return %arg0, %c0_i32, %c0_i32_0 : i32, i32, i32
  }
  func.func @transform_8(%arg0: i32, %arg1: i32) -> (i32, i32, i32) {
    %c0_i32 = arith.constant 0 : i32
    %c0_i32_0 = arith.constant 0 : i32
    %c0_i32_1 = arith.constant 0 : i32
    return %arg0, %c0_i32, %c0_i32_0 : i32, i32, i32
  }
  func.func @transform_9(%arg0: i32, %arg1: i32) -> (i32, i32, i32) {
    %c0_i32 = arith.constant 0 : i32
    %c0_i32_0 = arith.constant 0 : i32
    %c0_i32_1 = arith.constant 0 : i32
    return %arg0, %c0_i32, %c0_i32_0 : i32, i32, i32
  }
  func.func @transform_10(%arg0: i32, %arg1: i32) -> (i32, i32, i32, i32) {
    %c0_i32 = arith.constant 0 : i32
    %c0_i32_0 = arith.constant 0 : i32
    %c0_i32_1 = arith.constant 0 : i32
    %c0_i32_2 = arith.constant 0 : i32
    return %arg0, %c0_i32, %c0_i32_0, %c0_i32_1 : i32, i32, i32, i32
  }
  func.func @transform_11(%arg0: i32, %arg1: i32) -> (i32, i32, i32) {
    %c0_i32 = arith.constant 0 : i32
    %c0_i32_0 = arith.constant 0 : i32
    %c0_i32_1 = arith.constant 0 : i32
    return %arg0, %c0_i32, %c0_i32_0 : i32, i32, i32
  }
  func.func @transform_12(%arg0: i32, %arg1: i32) -> (i32, i32, i32) {
    %c0_i32 = arith.constant 0 : i32
    %c0_i32_0 = arith.constant 0 : i32
    %c0_i32_1 = arith.constant 0 : i32
    return %arg0, %c0_i32, %c0_i32_0 : i32, i32, i32
  }
  func.func @transform_13(%arg0: i32, %arg1: i32) -> (i32, i32, i32) {
    %c0_i32 = arith.constant 0 : i32
    %c0_i32_0 = arith.constant 0 : i32
    %c0_i32_1 = arith.constant 0 : i32
    return %arg0, %c0_i32, %c0_i32_0 : i32, i32, i32
  }
  func.func @transform_14(%arg0: i32, %arg1: i32) -> (i32, i32, i32) {
    %c0_i32 = arith.constant 0 : i32
    %c0_i32_0 = arith.constant 0 : i32
    %c0_i32_1 = arith.constant 0 : i32
    return %arg0, %c0_i32, %c0_i32_0 : i32, i32, i32
  }
  func.func @transform_15(%arg0: i32, %arg1: i32) -> (i32, i32, i32) {
    %c0_i32 = arith.constant 0 : i32
    %c0_i32_0 = arith.constant 0 : i32
    return %arg0, %arg1, %c0_i32 : i32, i32, i32
  }
  func.func @transform_16(%arg0: i32, %arg1: i32) -> (i32, i32, i32, i32) {
    %c0_i32 = arith.constant 0 : i32
    %c0_i32_0 = arith.constant 0 : i32
    %c0_i32_1 = arith.constant 0 : i32
    return %arg0, %arg1, %c0_i32, %c0_i32_0 : i32, i32, i32, i32
  }
  func.func @transform_17(%arg0: i32, %arg1: i32) -> (i32, i32, i32, i32) {
    %c0_i32 = arith.constant 0 : i32
    %c0_i32_0 = arith.constant 0 : i32
    %c0_i32_1 = arith.constant 0 : i32
    return %arg0, %arg1, %c0_i32, %c0_i32_0 : i32, i32, i32, i32
  }
}

</mosaic_0001>

<bundles_post_ra>
// kernel: decoder_forward.3
= control target key start
LH: loop header
LB: loop body
LE: loop exit
PB: predicated region body
PF: predicated region fallthrough
CT: control target
= control target key end

     0   :  { %s166_s0 = inlined_call_operand.vmem [shape: bf16[16,32], index: 0, kind: input, shape index: {}]   ;;  %s167_s1 = inlined_call_operand.vmem [shape: bf16[32,64], index: 1, kind: input, shape index: {}]   ;;  %s168_s2 = inlined_call_operand.vmem [shape: f32[1,64], index: 2, kind: input, shape index: {}]   ;;  %s169_s3 = inlined_call_operand.hbm [shape: f32[16,64], index: 3, kind: output, shape index: {}]  }
   0x1   :  { %v97_v0 = vld [vmem:[%s167_s1 + $0x8] sm:$0xff] }
   0x2   :  { %8 = vsyncpa [#allocation3], 0  ;;  %53 = vmatpush.bf16.msra.mxu0 %v97_v0  ;;  %v96_v1 = vld [vmem:[%s167_s1] sm:$0xff]  ;;  %vm43_vm0 = vcmask 261120   ;;  %vm61_vm1 = vcmask 523264   ;;  %s128_s20 = smov [#allocation2]  }
   0x3   :  { %v95_v2 = vld [vmem:[%s166_s0] sm:$0xff]  ;;  %s68_s21 = sshll.u32 %s128_s20, 4  ;;  %s70_s1 = sshll.u32 %s169_s3, 4  ;;  %s69_s21 = int_to_ptr.vmem [resolvable:$true] %s68_s21  ;;  %s71_s1 = int_to_ptr.hbm [resolvable:$true] %s70_s1 }
   0x4   :  { %v101_v3 = vld [vmem:[%s168_s2] ss:$0 sm:$0xff]  ;;  %s129_s0 = smov 128   ;;  %s130_s24 = smov 8  }
   0x6   :  { %54 = vmatpush.bf16.msra.mxu0 %v96_v1 }
   0x9   :  { %94 = vmatmul.msk.bf16.vlgmr.msra.gmra.mxu0 %vm43_vm0, %v95_v2 }
  0x86   :  { %v56_v4 = vpop.f32.mrf.mxu0 }
  0x87   :  { %v57_v5 = vadd.f32 %v101_v3, %v56_v4 }
  0x89   :  { %62 = vst.msk [vmem:[#allocation2] sm:$0xff] %vm61_vm1, %v57_v5 }
  0x8e   :  { %v58_v6 = vpop.f32.mrf.mxu0 }
  0x8f   :  { %v59_v7 = vadd.f32 %v101_v3, %v58_v6 }
  0x91   :  { %63 = vst.msk [vmem:[#allocation2 + $0x8] sm:$0xff] %vm61_vm1, %v59_v7 }
  0x92   :  { %76 = dma.vmem_to_hbm [thread:$0]  %s69_s21, 256, %s71_s1, [#allocation3], %s129_s0, %s129_s0, %s130_s24  }
  0x93   :  { %126 = dma.done.wait [#allocation3], 256  }
  0x94   :  { %127 = vsyncadd [#allocation3], 4294967040 }
  0x95   :  { %81 = vsyncpa [#allocation3], 1 }

// kernel: decoder_forward.2
= control target key start
LH: loop header
LB: loop body
LE: loop exit
PB: predicated region body
PF: predicated region fallthrough
CT: control target
= control target key end

     0   :  { %s3354_s24 = smov 0   ;;  %s3356_s25 = smov 0   ;;  %s3862_s0 = inlined_call_operand.vmem [shape: f32[16,32], index: 0, kind: input, shape index: {}]   ;;  %s3863_s1 = inlined_call_operand.vmem [shape: bf16[16,32], index: 1, kind: input, shape index: {}]   ;;  %s3864_s2 = inlined_call_operand.vmem [shape: f32[2,1,8], index: 2, kind: input, shape index: {}]   ;;  %s3865_s3 = inlined_call_operand.vmem [shape: bf16[2,32,32], index: 3, kind: input, shape index: {}]   ;;  %s3866_s4 = inlined_call_operand.vmem [shape: bf16[2,32,32], index: 4, kind: input, shape index: {}]   ;;  %s3867_s5 = inlined_call_operand.vmem [shape: bf16[2,32,32], index: 5, kind: input, shape index: {}]   ;;  %s3868_s6 = inlined_call_operand.vmem [shape: bf16[2,4,8,32], index: 6, kind: input, shape index: {}]   ;;  %s3869_s7 = inlined_call_operand.vmem [shape: bf16[2,32,32], index: 7, kind: input, shape index: {}]   ;;  %s3870_s8 = inlined_call_operand.vmem [shape: bf16[2,32,32], index: 8, kind: input, shape index: {}]   ;;  %s3871_s9 = inlined_call_operand.vmem [shape: bf16[2,32,32], index: 9, kind: input, shape index: {}]   ;;  %s3872_s10 = inlined_call_operand.vmem [shape: bf16[2,4,8,32], index: 10, kind: input, shape index: {}]   ;;  %s3873_s11 = inlined_call_operand.vmem [shape: bf16[2,32,64], index: 11, kind: input, shape index: {}]   ;;  %s3874_s12 = inlined_call_operand.vmem [shape: bf16[2,64,32], index: 12, kind: input, shape index: {}]   ;;  %s3875_s13 = inlined_call_operand.vmem [shape: f32[2,1,64], index: 13, kind: input, shape index: {}]   ;;  %s3876_s14 = inlined_call_operand.vmem [shape: f32[2,17,32], index: 14, kind: input, shape index: {}]   ;;  %s3877_s15 = inlined_call_operand.vmem [shape: bf16[2,16,32], index: 15, kind: output, shape index: {0}]   ;;  %s3878_s16 = inlined_call_operand.vmem [shape: bf16[2,2,8,8], index: 16, kind: output, shape index: {1}]   ;;  %s3879_s17 = inlined_call_operand.vmem [shape: bf16[2,2,8,8], index: 17, kind: output, shape index: {2}]  }
   0x1   :  { %3886 = sst [smem:[#allocation5_spill]] %s3862_s0  ;;  %s3358_s26 = smov 0  }
   0x2   :  { %3887 = sst [smem:[#allocation6_spill]] %s3863_s1 }
   0x3 LB: > { %3888 = sst [smem:[#allocation2_spill]] %s3253_s25  ;;  %s40_s27 = sadd.s32 1, %s3253_s25  ;;  %s3257_s26 = sphi %s3358_s26, %s28_s26   ;;  %s3253_s25 = sphi %s3356_s25, %s3896_s25   ;;  %s3249_s24 = sphi %s3354_s24, %s3895_s24  }
   0x4   : > { %3889 = sst [smem:[#allocation3_spill]] %s3257_s26  ;;  %p2933_p0 = scmp.ge.s32.totalorder %s3257_s26, 1 }
   0x5   : > { %p42_p1 = scmp.ge.s32.totalorder %s40_s27, 2  ;;  %p650_p2 = scmp.lt.s32.totalorder %s3257_s26, 3 }
   0x7   : > { %s3898_s27 = smov (%p42_p1, %s40_s27), 0  ;;  %p651_p3 = pnand %p2933_p0, %p650_p2 }
   0x8   : > { %3890 = sst [smem:[#allocation4_spill]] %s3898_s27  ;;  %p808_p4 = scmp.lt.s32.totalorder (!%p651_p3), %s3249_s24, 1 }
   0x9   : > { %654 = sbr.rel (%p651_p3) target bundleno = 4824 (0x12d8), region = 80  ;;  %s3891_s0 = sld [smem:[#allocation5_spill]] (!%p651_p3) }
   0xa   : > { %s3260_s25 = smov (!%p651_p3), 120   ;;  %s3884_s20 = smov (!%p651_p3), 104  }
   0xb   : > { %s3892_s18 = sld [smem:[#allocation6_spill]] (!%p651_p3) }
   0xe   : > { %vm920_vm0 = vcmask 261120   ;;  %v3259_v4 = vmov 32.0   ;;  %s3900_s24 = smov (!%p808_p4, %s3249_s24), 1  ;;  %vm1085_vm8 = vcmask 64512   ;;  %vm1153_vm9 = vcmask 1043456  }
   0xf   : > { %v3377_v0 = vld [vmem:[%s3891_s0] sm:$0xff]  ;;  %v3384_v2 = vld [vmem:[%s3891_s0 + $0x8] sm:$0xff]  ;;  %3153 = vrcp.f32 %v3259_v4  ;;  %s3119_s19 = smul.u32 24, %s3900_s24  ;;  %s3407_s22 = sshll.u32 %s3900_s24, 4  ;;  %vm2567_vm11 = vcmask 60416  }
  0x10   : > { %v921_v1 = vsel %vm920_vm0, %v3377_v0, 0.0  ;;  %v924_v3 = vsel %vm920_vm0, %v3384_v2, 0.0  ;;  %s812_s29 = scalar_lea.vmem %s3865_s3, %s3407_s22  ;;  %s817_s0 = scalar_lea.vmem %s3866_s4, %s3407_s22 }
  0x11   : > { %922 = vadd.xlane.f32.xlu0 %v921_v1  ;;  %s3404_s21 = scalar_lea.vmem %s3876_s14, %s3119_s19  ;;  %s822_s26 = scalar_lea.vmem %s3867_s5, %s3407_s22  ;;  %v3102_v21 = vld [vmem:[%s812_s29 + $0x8] sm:$0xff]  ;;  %v3101_v25 = vld [vmem:[%s812_s29] sm:$0xff] }
  0x12   : > { %v3104_v22 = vld [vmem:[%s817_s0 + $0x8] sm:$0xff]  ;;  %1017 = vmatpush.bf16.msra.mxu0 %v3102_v21  ;;  %v3103_v26 = vld [vmem:[%s817_s0] sm:$0xff]  ;;  %s3262_s0 = smov 112   ;;  %s3538_s29 = scalar_lea.vmem %s3868_s6, %s3407_s22 }
  0x13   : > { %v3106_v23 = vld [vmem:[%s822_s26 + $0x8] sm:$0xff]  ;;  %1044 = vmatpush.bf16.msra.mxu1 %v3104_v22  ;;  %v3105_v28 = vld [vmem:[%s822_s26] sm:$0xff]  ;;  %s3590_s30 = sshll.u32 %s3900_s24, 3  ;;  %s837_s23 = scalar_lea.vmem %s3870_s8, %s3407_s22 }
  0x14   : > { %1071 = vmatpush.bf16.msra.mxu2 %v3106_v23  ;;  %v3424_v44 = vld [vmem:[%s3404_s21] sm:$0xff]  ;;  %s884_s27 = scalar_lea.vmem %s3878_s16, %s3590_s30  ;;  %s842_s1 = scalar_lea.vmem %s3871_s9, %s3407_s22 }
  0x15   : > { %v3154_v5 = vpop.eup %3153  ;;  %v972_v47 = vperm.slane %v3424_v44, 0  ;;  %v975_v52 = vperm.slane %v3424_v44, 1  ;;  %v1025_v57 = vperm.slane %v3424_v44, 3  ;;  %v995_v58 = vperm.slane %v3424_v44, 2  ;;  %s894_s26 = scalar_lea.vmem %s3879_s17, %s3590_s30  ;;  %s860_s19 = scalar_lea.vmem %s3875_s13, %s3900_s24 }
  0x16   : > { %v928_v6 = vmul.f32 32.0, %v3154_v5  ;;  %vm932_vm1 = vweird.f32 %v3154_v5  ;;  %1018 = vmatpush.bf16.msra.mxu0 %v3101_v25  ;;  %v1052_v1 = vperm.slane %v3424_v44, 4  ;;  %s852_s28 = scalar_lea.vmem %s3873_s11, %s3407_s22 }
  0x17   : > { %1045 = vmatpush.bf16.msra.mxu1 %v3103_v26 }
  0x18   : > { %v929_v7 = vsub.f32 1.0, %v928_v6  ;;  %1072 = vmatpush.bf16.msra.mxu2 %v3105_v28 }
  0x19   : > { %925 = vadd.xlane.f32.xlu0 %v924_v3 }
  0x1a   : > { %v930_v8 = vmul.f32 %v3154_v5, %v929_v7 }
  0x1c   : > { %v931_v9 = vadd.f32 %v3154_v5, %v930_v8 }
  0x1e   : > { %v3388_v10 = vsel %vm932_vm1, %v3154_v5, %v931_v9 }
  0x84   : > { %v923_v11 = vpop.xlane.xlu0 %922 }
  0x85   : > { %v934_v12 = vmul.f32 %v3388_v10, %v923_v11 }
  0x87   : > { %v936_v13 = vsub.f32 %v3377_v0, %v934_v12 }
  0x89   : > { %v938_v14 = vmul.f32 %v936_v13, %v936_v13 }
  0x8b   : > { %v940_v15 = vsel %vm920_vm0, %v938_v14, 0.0 }
  0x8c   : > { %941 = vadd.xlane.f32.xlu1 %v940_v15  ;;  %v926_v16 = vpop.xlane.xlu0 %925 }
  0x8d   : > { %v935_v17 = vmul.f32 %v3388_v10, %v926_v16 }
  0x8f   : > { %v937_v18 = vsub.f32 %v3384_v2, %v935_v17 }
  0x91   : > { %v939_v19 = vmul.f32 %v937_v18, %v937_v18 }
  0x93   : > { %v943_v20 = vsel %vm920_vm0, %v939_v19, 0.0 }
  0x94   : > { %944 = vadd.xlane.f32.xlu1 %v943_v20 }
  0xff   : > { %v942_v24 = vpop.xlane.xlu1 %941 }
 0x100   : > { %v946_v27 = vmul.f32 %v942_v24, %v3388_v10 }
 0x102   : > { %v948_v29 = vadd.f32 1e-05, %v946_v27 }
 0x104   : > { %3155 = vrsqrt.f32 %v948_v29  ;;  %vm956_vm3 = vweird.f32 %v948_v29 }
 0x107   : > { %v945_v30 = vpop.xlane.xlu1 %944 }
 0x108   : > { %v947_v31 = vmul.f32 %v945_v30, %v3388_v10 }
 0x10a   : > { %v3156_v32 = vpop.eup %3155  ;;  %v949_v33 = vadd.f32 1e-05, %v947_v31 }
 0x10b   : > { %v951_v34 = vmul.f32 %v3156_v32, %v948_v29  ;;  %vm957_vm2 = vweird.f32 %v3156_v32 }
 0x10c   : > { %3157 = vrsqrt.f32 %v949_v33  ;;  %vm958_vm4 = vmor %vm956_vm3, %vm957_vm2  ;;  %vm966_vm6 = vweird.f32 %v949_v33 }
 0x10d   : > { %v952_v35 = vmul.f32 %v3156_v32, %v951_v34 }
 0x10f   : > { %v953_v36 = vmul.f32 0.5, %v952_v35 }
 0x111   : > { %v954_v37 = vsub.f32 1.5, %v953_v36 }
 0x112   : > { %v3158_v38 = vpop.eup %3157 }
 0x113   : > { %v955_v39 = vmul.f32 %v3156_v32, %v954_v37  ;;  %v961_v40 = vmul.f32 %v3158_v38, %v949_v33  ;;  %vm967_vm5 = vweird.f32 %v3158_v38  ;;  %v3149_v37 = vld [vmem:[%s3864_s2] ss:$0 sm:$0xff] }
 0x114   : > { %vm968_vm7 = vmor %vm966_vm6, %vm967_vm5 }
 0x115   : > { %v962_v41 = vmul.f32 %v3158_v38, %v961_v40  ;;  %v959_v42 = vsel %vm958_vm4, %v3156_v32, %v955_v39  ;;  %v904_v32 = vlaneseq }
 0x116   : > { %v970_v46 = vmul.f32 %v959_v42, %v936_v13 }
 0x117   : > { %v963_v43 = vmul.f32 0.5, %v962_v41  ;;  %v905_v34 = vshrl.u32 %v904_v32, 7  ;;  %v907_v35 = vand.u32 127, %v904_v32 }
 0x118   : > { %v973_v51 = vmul.f32 %v972_v47, %v970_v46 }
 0x119   : > { %v964_v45 = vsub.f32 1.5, %v963_v43  ;;  %vm908_vm10 = vcmp.gt.s32.totalorder %v907_v35, %v905_v34 }
 0x11a   : > { %v976_v54 = vadd.f32 %v975_v52, %v973_v51 }
 0x11b   : > { %v965_v48 = vmul.f32 %v3158_v38, %v964_v45 }
 0x11d   : > { %v969_v49 = vsel %vm968_vm7, %v3158_v38, %v965_v48  ;;  %v3261_v38 = vmov 0.0  }
 0x11e   : > { %v971_v50 = vmul.f32 %v969_v49, %v937_v18  ;;  %v909_v39 = vsel %vm908_vm10, -1e+30, %v3261_v38 }
 0x11f   : > { %v3469_v41 = vadd.f32 %v3149_v37, %v909_v39 }
 0x120   : > { %v974_v53 = vmul.f32 %v972_v47, %v971_v50 }
 0x122   : > { %v977_v55 = vadd.f32 %v975_v52, %v974_v53 }
 0x124   : > { %v994_v56 = vpack.c.bf16 %v977_v55, %v976_v54 }
 0x126   : > { %2969 = vmatmul.msk.bf16.vlgmr.msra.gmra.mxu0 %vm920_vm0, %v994_v56  ;;  %2978 = vmatmul.msk.bf16.vlgmr.msra.gmra.mxu1 %vm920_vm0, %v994_v56 }
 0x127   : > { %2987 = vmatmul.msk.bf16.vlgmr.msra.gmra.mxu2 %vm920_vm0, %v994_v56 }
 0x1a3   : > { %v1020_v59 = vpop.f32.mrf.mxu0  ;;  %v1047_v60 = vpop.f32.mrf.mxu1 }
 0x1a4   : > { %v1048_v61 = vadd.f32 %v1047_v60, %v1025_v57  ;;  %v1021_v63 = vadd.f32 %v1020_v59, %v995_v58  ;;  %v3150_v60 = vld [vmem:[%s3864_s2 + $0x1] ss:$0 sm:$0xff] }
 0x1a6   : > { %v1081_v62 = vpack.c.bf16 %v1048_v61, %v1048_v61  ;;  %v1079_v7 = vpack.c.bf16 %v1021_v63, %v1021_v63  ;;  %v3481_v61 = vadd.f32 %v3150_v60, %v909_v39 }
 0x1a8   : > { %v1196_v3 = vunpack.c.l.b16 %v1081_v62  ;;  %v1090_v4 = vsel %vm1085_vm8, %v1081_v62, 0  ;;  %v1191_v17 = vunpack.c.l.b16 %v1079_v7 }
 0x1a9   : > { %1099 = vmatpush.bf16.xpose.msra.mxu3 %v1090_v4 }
 0x1aa   : > { %v3435_v5 = vpack.c.b16 %v1196_v3, %v1196_v3  ;;  %v1074_v6 = vpop.f32.mrf.mxu2  ;;  %v3449_v25 = vpack.c.b16 %v1191_v17, %v1191_v17 }
 0x1ab   : > { %v1075_v8 = vadd.f32 %v1074_v6, %v1052_v1  ;;  %v1022_v9 = vpop.f32.mrf.mxu0  ;;  %v1049_v11 = vpop.f32.mrf.mxu1 }
 0x1ac   : > { %v1023_v12 = vadd.f32 %v1022_v9, %v995_v58  ;;  %v1050_v13 = vadd.f32 %v1049_v11, %v1025_v57  ;;  %1198 = vrot.lane.b32.xlu2 %v3435_v5, %s3260_s25 }
 0x1ad   : > { %v3439_v14 = vpack.c.bf16 %v1075_v8, %v1075_v8 }
 0x1ae   : > { %v1080_v15 = vpack.c.bf16 %v1023_v12, %v1023_v12  ;;  %v1082_v16 = vpack.c.bf16 %v1050_v13, %v1050_v13 }
 0x1af   : > { %v1155_v18 = vsel %vm1153_vm9, %v3439_v14, 0  ;;  %v1275_v8 = vunpack.c.l.b16 %v3439_v14 }
 0x1b0   : > { %v1220_v19 = vunpack.c.l.b16 %v1080_v15  ;;  %v1225_v20 = vunpack.c.l.b16 %v1082_v16  ;;  %1164 = vmatpush.bf16.msrb.mxu1 %v1155_v18  ;;  %2988 = vmatmul.msk.bf16.vlgmr.msra.gmra.mxu3 %vm1085_vm8, %v1079_v7  ;;  %v1109_v21 = vsel %vm1085_vm8, %v1082_v16, 0 }
 0x1b1   : > { %1118 = vmatpush.bf16.xpose.msrb.mxu0 %v1109_v21  ;;  %v3491_v11 = vpack.c.b16 %v1275_v8, %v1275_v8 }
 0x1b2   : > { %v3445_v22 = vpack.c.b16 %v1220_v19, %v1220_v19  ;;  %v3447_v23 = vpack.c.b16 %v1225_v20, %v1225_v20  ;;  %v1076_v24 = vpop.f32.mrf.mxu2 }
 0x1b3   : > { %v1077_v26 = vadd.f32 %v1076_v24, %v1052_v1 }
 0x1b4   : > { %1227 = vrot.lane.b32.xlu0 %v3447_v23, %s3260_s25  ;;  %1222 = vrot.lane.b32.xlu1 %v3445_v22, %s3260_s25 }
 0x1b5   : > { %v3455_v27 = vpack.c.bf16 %v1077_v26, %v1077_v26  ;;  %1193 = vrot.lane.b32.xlu2 %v3449_v25, %s3260_s25 }
 0x1b7   : > { %v1174_v28 = vsel %vm1153_vm9, %v3455_v27, 0  ;;  %v1299_v26 = vunpack.c.l.b16 %v3455_v27 }
 0x1b8   : > { %1183 = vmatpush.bf16.msrb.mxu2 %v1174_v28  ;;  %2989 = vmatmul.msk.bf16.vlgmr.msrb.gmra.mxu0 %vm1085_vm8, %v1080_v15 }
 0x1b9   : > { %v3504_v28 = vpack.c.b16 %v1299_v26, %v1299_v26 }
 0x206   : > { %v1199_v29 = vpop.permute.xlu2 %1198 }
 0x207   : > { %v1204_v30 = vsel %vm1085_vm8, %v1199_v29, 0 }
 0x208   : > { %1213 = vmatpush.bf16.xpose.msrb.mxu3 %v1204_v30 }
 0x20f   : > { %v1194_v31 = vpop.permute.xlu2 %1193 }
 0x210   : > { %2992 = vmatmul.msk.bf16.vlgmr.msrb.gmra.mxu3 %vm1085_vm8, %v1194_v31 }
 0x226   : > { %v1228_v33 = vpop.permute.xlu0 %1227  ;;  %v1223_v40 = vpop.permute.xlu1 %1222 }
 0x227   : > { %v1233_v36 = vsel %vm1085_vm8, %v1228_v33, 0 }
 0x228   : > { %1242 = vmatpush.bf16.xpose.msra.mxu0 %v1233_v36 }
 0x22f   : > { %2993 = vmatmul.msk.bf16.vlgmr.msra.gmra.mxu0 %vm1085_vm8, %v1223_v40 }
 0x233   : > { %v1101_v42 = vpop.f32.mrf.mxu3 }
 0x234   : > { %v1102_v43 = vadd.f32 %v1101_v42, %v3469_v41 }
 0x235   : > { %v1120_v45 = vpop.f32.mrf.mxu0 }
 0x236   : > { %v1124_v46 = vsel %vm1085_vm8, %v1102_v43, -inf  ;;  %v1121_v14 = vadd.f32 %v1120_v45, %v3481_v61 }
 0x237   : > { %1125 = vmax.xlane.f32.xlu2 %v1124_v46 }
 0x238   : > { %v1127_v20 = vsel %vm1085_vm8, %v1121_v14, -inf }
 0x23b   : > { %v1103_v47 = vpop.f32.mrf.mxu3 }
 0x23d   : > { %v1122_v48 = vpop.f32.mrf.mxu0 }
 0x293   : > { %v1215_v49 = vpop.f32.mrf.mxu3 }
 0x294   : > { %v1216_v50 = vadd.f32 %v1215_v49, %v3469_v41 }
 0x296   : > { %v1248_v51 = vsel %vm1085_vm8, %v1216_v50, -inf }
 0x297   : > { %1249 = vmax.xlane.f32.xlu0 %v1248_v51 }
 0x29b   : > { %v1217_v52 = vpop.f32.mrf.mxu3 }
 0x2aa   : > { %v1126_v53 = vpop.xlane.xlu2 %1125 }
 0x2ab   : > { %1365 = vrot.lane.b32.xlu0 %v3435_v5, %s3262_s0  ;;  %v1130_v54 = vsub.f32 %v1102_v43, %v1126_v53 }
 0x2ac   : > { %v1244_v55 = vpop.f32.mrf.mxu0 }
 0x2ad   : > { %v1132_v56 = vmul.f32 1.442695, %v1130_v54  ;;  %v1245_v62 = vadd.f32 %v1244_v55, %v3481_v61 }
 0x2af   : > { %3159 = vpow2.f32 %v1132_v56  ;;  %v1251_v63 = vsel %vm1085_vm8, %v1245_v62, -inf }
 0x2b4   : > { %v1246_v57 = vpop.f32.mrf.mxu0 }
 0x2b5   : > { %v3160_v58 = vpop.eup %3159 }
 0x2b6   : > { %v1136_v59 = vsel %vm1085_vm8, %v3160_v58, 0.0 }
 0x2b7   : > { %1137 = vadd.xlane.f32.xlu1 %v1136_v59 }
 0x2d0   : > { %1363 = vrot.lane.b32.xlu1 %v3449_v25, %s3262_s0 }
 0x2d5   : > { %1252 = vmax.xlane.f32.xlu0 %v1251_v63 }
 0x2e9   : > { %1388 = vrot.lane.b32.xlu0 %v3447_v23, %s3262_s0 }
 0x30a   : > { %v1250_v1 = vpop.xlane.xlu0 %1249 }
 0x30b   : > { %v1254_v3 = vsub.f32 %v1216_v50, %v1250_v1 }
 0x30d   : > { %v1256_v4 = vmul.f32 1.442695, %v1254_v3 }
 0x30f   : > { %3161 = vpow2.f32 %v1256_v4 }
 0x315   : > { %v3162_v6 = vpop.eup %3161 }
 0x316   : > { %v1260_v7 = vsel %vm1085_vm8, %v3162_v6, 0.0 }
 0x317   : > { %1261 = vadd.xlane.f32.xlu2 %v1260_v7 }
 0x31d   : > { %v1366_v16 = vpop.permute.xlu0 %1365 }
 0x31e   : > { %v1371_v34 = vsel %vm1085_vm8, %v1366_v16, 0 }
 0x32a   : > { %v1138_v9 = vpop.xlane.xlu1 %1137 }
 0x32b   : > { %3163 = vrcp.f32 %v1138_v9 }
 0x32f   : > { %1277 = vrot.lane.b32.xlu2 %v3491_v11, %s3260_s25 }
 0x331   : > { %v3164_v12 = vpop.eup %3163 }
 0x332   : > { %v3495_v13 = vmul.f32 %v3164_v12, %v3160_v58 }
 0x334   : > { %v1148_v15 = vpack.c.bf16 %v3495_v13, %v3495_v13 }
 0x336   : > { %2990 = vmatmul.msk.bf16.vlgmr.msrb.gmra.mxu1 %vm1085_vm8, %v1148_v15 }
 0x342   : > { %v1364_v27 = vpop.permute.xlu1 %1363 }
 0x348   : > { %v1253_v17 = vpop.xlane.xlu0 %1252 }
 0x349   : > { %v1255_v18 = vsub.f32 %v1245_v62, %v1253_v17  ;;  %v990_v17 = vld [vmem:[%s3538_s29] sm:$0xf] }
 0x34b   : > { %v1258_v19 = vmul.f32 1.442695, %v1255_v18  ;;  %v1347_v18 = vsel %vm1153_vm9, %v990_v17, 0 }
 0x34c   : > { %1356 = vmatpush.bf16.msrb.mxu0 %v1347_v18 }
 0x34d   : > { %3165 = vpow2.f32 %v1258_v19 }
 0x353   : > { %v3166_v21 = vpop.eup %3165 }
 0x354   : > { %v1263_v24 = vsel %vm1085_vm8, %v3166_v21, 0.0 }
 0x358   : > { %1128 = vmax.xlane.f32.xlu2 %v1127_v20 }
 0x35b   : > { %v1389_v56 = vpop.permute.xlu0 %1388 }
 0x360   : > { %1264 = vadd.xlane.f32.xlu2 %v1263_v24 }
 0x378   : > { %1301 = vrot.lane.b32.xlu2 %v3504_v28, %s3260_s25 }
 0x38a   : > { %v1262_v29 = vpop.xlane.xlu2 %1261 }
 0x38b   : > { %3167 = vrcp.f32 %v1262_v29 }
 0x391   : > { %v3168_v30 = vpop.eup %3167 }
 0x392   : > { %v3508_v31 = vmul.f32 %v3168_v30, %v3162_v6  ;;  %v1278_v32 = vpop.permute.xlu2 %1277 }
 0x393   : > { %v1283_v33 = vsel %vm1153_vm9, %v1278_v32, 0 }
 0x394   : > { %v1272_v35 = vpack.c.bf16 %v3508_v31, %v3508_v31  ;;  %1292 = vmatpush.bf16.msra.mxu1 %v1283_v33 }
 0x397   : > { %2994 = vmatmul.msk.bf16.vlgmr.msra.gmra.mxu1 %vm1085_vm8, %v1272_v35 }
 0x398   : > { %1380 = vmatpush.bf16.xpose.msrb.mxu1 %v1371_v34 }
 0x3a7   : > { %2998 = vmatmul.msk.bf16.vlgmr.msrb.gmra.mxu1 %vm1085_vm8, %v1364_v27 }
 0x3b3   : > { %v3516_v36 = vpop.f32.mrf.mxu1 }
 0x3bb   : > { %v1168_v37 = vpop.f32.mrf.mxu1 }
 0x3cb   : > { %v1129_v38 = vpop.xlane.xlu2 %1128 }
 0x3cc   : > { %v1131_v39 = vsub.f32 %v1121_v14, %v1129_v38 }
 0x3ce   : > { %v1134_v40 = vmul.f32 1.442695, %v1131_v39 }
 0x3d0   : > { %3169 = vpow2.f32 %v1134_v40  ;;  %v1270_v40 = vadd.f32 %v3508_v31, %v3495_v13 }
 0x3d3   : > { %v1265_v42 = vpop.xlane.xlu2 %1264 }
 0x3d6   : > { %v3170_v43 = vpop.eup %3169 }
 0x3d7   : > { %v1139_v45 = vsel %vm1085_vm8, %v3170_v43, 0.0 }
 0x3d8   : > { %1140 = vadd.xlane.f32.xlu1 %v1139_v45 }
 0x3db   : > { %v1302_v46 = vpop.permute.xlu2 %1301 }
 0x3dc   : > { %v1307_v47 = vsel %vm1153_vm9, %v1302_v46, 0 }
 0x3dd   : > { %1316 = vmatpush.bf16.msra.mxu2 %v1307_v47 }
 0x3f1   : > { %1386 = vrot.lane.b32.xlu1 %v3445_v22, %s3262_s0 }
 0x3f9   : > { %1435 = vrot.lane.b32.xlu1 %v3491_v11, %s3262_s0 }
 0x401   : > { %1502 = vrot.lane.b32.xlu1 %v3435_v5, %s3884_s20 }
 0x409   : > { %1525 = vrot.lane.b32.xlu1 %v3447_v23, %s3884_s20  ;;  %v991_v23 = vld [vmem:[%s3538_s29 + $0x4] sm:$0xf] }
 0x411   : > { %1500 = vrot.lane.b32.xlu1 %v3449_v25, %s3884_s20  ;;  %v1327_v25 = vsel %vm1153_vm9, %v991_v23, 0 }
 0x412   : > { %1336 = vmatpush.bf16.msra.mxu3 %v1327_v25 }
 0x414   : > { %v1294_v48 = vpop.f32.mrf.mxu1 }
 0x41c   : > { %v1296_v49 = vpop.f32.mrf.mxu1 }
 0x424   : > { %v1382_v50 = vpop.f32.mrf.mxu1 }
 0x425   : > { %v1383_v51 = vadd.f32 %v1382_v50, %v3469_v41 }
 0x427   : > { %v1409_v52 = vsel %vm1085_vm8, %v1383_v51, -inf }
 0x428   : > { %1410 = vmax.xlane.f32.xlu0 %v1409_v52 }
 0x42c   : > { %v1384_v53 = vpop.f32.mrf.mxu1 }
 0x43c   : > { %1523 = vrot.lane.b32.xlu0 %v3445_v22, %s3884_s20  ;;  %v1394_v22 = vsel %vm1085_vm8, %v1389_v56, 0 }
 0x44b   : > { %v1141_v5 = vpop.xlane.xlu1 %1140 }
 0x44c   : > { %3171 = vrcp.f32 %v1141_v5 }
 0x44d   : > { %3173 = vrcp.f32 %v1265_v42 }
 0x452   : > { %v3172_v54 = vpop.eup %3171 }
 0x453   : > { %v3542_v55 = vmul.f32 %v3172_v54, %v3170_v43  ;;  %v3174_v58 = vpop.eup %3173 }
 0x454   : > { %v3548_v59 = vmul.f32 %v3174_v58, %v3166_v21 }
 0x455   : > { %v1149_v57 = vpack.c.bf16 %v3542_v55, %v3542_v55 }
 0x456   : > { %v1273_v62 = vpack.c.bf16 %v3548_v59, %v3548_v59 }
 0x457   : > { %2991 = vmatmul.msk.bf16.vlgmr.msrb.gmra.mxu2 %vm1085_vm8, %v1149_v57 }
 0x458   : > { %1403 = vmatpush.bf16.xpose.msrb.mxu2 %v1394_v22 }
 0x463   : > { %v1387_v60 = vpop.permute.xlu1 %1386 }
 0x467   : > { %2995 = vmatmul.msk.bf16.vlgmr.msra.gmra.mxu2 %vm1085_vm8, %v1273_v62 }
 0x46b   : > { %v1436_v63 = vpop.permute.xlu1 %1435 }
 0x46c   : > { %v1441_v1 = vsel %vm1153_vm9, %v1436_v63, 0 }
 0x46d   : > { %1450 = vmatpush.bf16.msrb.mxu3 %v1441_v1 }
 0x473   : > { %v1503_v3 = vpop.permute.xlu1 %1502 }
 0x474   : > { %v1508_v4 = vsel %vm1085_vm8, %v1503_v3, 0 }
 0x475   : > { %1517 = vmatpush.bf16.xpose.msra.mxu2 %v1508_v4 }
 0x477   : > { %2999 = vmatmul.msk.bf16.vlgmr.msrb.gmra.mxu2 %vm1085_vm8, %v1387_v60 }
 0x47b   : > { %v1526_v6 = vpop.permute.xlu1 %1525 }
 0x47c   : > { %v1531_v26 = vsel %vm1085_vm8, %v1526_v6, 0 }
 0x483   : > { %v1501_v7 = vpop.permute.xlu1 %1500 }
 0x487   : > { %3003 = vmatmul.msk.bf16.vlgmr.msra.gmra.mxu2 %vm1085_vm8, %v1501_v7  ;;  %v1271_v7 = vadd.f32 %v3548_v59, %v3542_v55 }
 0x49b   : > { %v1411_v8 = vpop.xlane.xlu0 %1410 }
 0x49c   : > { %v1415_v9 = vsub.f32 %v1383_v51, %v1411_v8 }
 0x49e   : > { %v1417_v12 = vmul.f32 1.442695, %v1415_v9 }
 0x4a0   : > { %3175 = vpow2.f32 %v1417_v12 }
 0x4a6   : > { %v3176_v15 = vpop.eup %3175 }
 0x4a7   : > { %v1421_v16 = vsel %vm1085_vm8, %v3176_v15, 0.0 }
 0x4a8   : > { %1422 = vadd.xlane.f32.xlu2 %v1421_v16 }
 0x4da   : > { %v1185_v19 = vpop.f32.mrf.mxu2 }
 0x4db   : > { %v1189_v14 = vpack.c.bf16 %v1185_v19, %v3516_v36 }
 0x4dd   : > { %2997 = vmatmul.msk.bf16.vlgmr.msrb.gmra.mxu0 %vm1085_vm8, %v1189_v14 }
 0x4e2   : > { %v1187_v20 = vpop.f32.mrf.mxu2 }
 0x4ea   : > { %v1318_v21 = vpop.f32.mrf.mxu2 }
 0x4eb   : > { %v1322_v24 = vpack.c.bf16 %v1318_v21, %v1294_v48 }
 0x4ed   : > { %2996 = vmatmul.msk.bf16.vlgmr.msra.gmra.mxu3 %vm1085_vm8, %v1322_v24 }
 0x4ee   : > { %1540 = vmatpush.bf16.xpose.msra.mxu3 %v1531_v26  ;;  %v992_v26 = vld [vmem:[%s3538_s29 + $0x8] sm:$0xf] }
 0x4f2   : > { %v1320_v29 = vpop.f32.mrf.mxu2 }
 0x4f3   : > { %v1482_v29 = vsel %vm1153_vm9, %v992_v26, 0 }
 0x4f4   : > { %1491 = vmatpush.bf16.msra.mxu1 %v1482_v29 }
 0x4fa   : > { %v1405_v30 = vpop.f32.mrf.mxu2 }
 0x4fb   : > { %v1406_v32 = vadd.f32 %v1405_v30, %v3481_v61 }
 0x4fd   : > { %v1412_v33 = vsel %vm1085_vm8, %v1406_v32, -inf }
 0x4fe   : > { %1413 = vmax.xlane.f32.xlu2 %v1412_v33 }
 0x502   : > { %v1407_v34 = vpop.f32.mrf.mxu2 }
 0x50a   : > { %v1519_v35 = vpop.f32.mrf.mxu2 }
 0x50b   : > { %v1520_v27 = vadd.f32 %v1519_v35, %v3469_v41  ;;  %v1524_v41 = vpop.permute.xlu0 %1523 }
 0x50d   : > { %v1546_v36 = vsel %vm1085_vm8, %v1520_v27, -inf }
 0x50e   : > { %1547 = vmax.xlane.f32.xlu0 %v1546_v36 }
 0x512   : > { %v1521_v37 = vpop.f32.mrf.mxu2 }
 0x516   : > { %1456 = vrot.lane.b32.xlu2 %v3504_v28, %s3262_s0 }
 0x51b   : > { %v1423_v38 = vpop.xlane.xlu2 %1422 }
 0x51c   : > { %3177 = vrcp.f32 %v1423_v38 }
 0x522   : > { %v3178_v39 = vpop.eup %3177  ;;  %1572 = vrot.lane.b32.xlu0 %v3491_v11, %s3884_s20 }
 0x523   : > { %v1429_v42 = vmul.f32 %v3178_v39, %v3176_v15 }
 0x525   : > { %v1431_v43 = vadd.f32 %v1429_v42, %v1270_v40  ;;  %v1433_v45 = vpack.c.bf16 %v1429_v42, %v1429_v42 }
 0x527   : > { %3000 = vmatmul.msk.bf16.vlgmr.msrb.gmra.mxu3 %vm1085_vm8, %v1433_v45 }
 0x537   : > { %3004 = vmatmul.msk.bf16.vlgmr.msra.gmra.mxu3 %vm1085_vm8, %v1524_v41 }
 0x55a   : > { %v1358_v46 = vpop.f32.mrf.mxu0 }
 0x562   : > { %v1360_v30 = vpop.f32.mrf.mxu0 }
 0x570   : > { %v1338_v47 = vpop.f32.mrf.mxu3 }
 0x571   : > { %v3576_v48 = vadd.f32 %v1358_v46, %v1338_v47  ;;  %v1414_v49 = vpop.xlane.xlu2 %1413  ;;  %v993_v47 = vld [vmem:[%s3538_s29 + $0xc] sm:$0xf] }
 0x572   : > { %v1416_v50 = vsub.f32 %v1406_v32, %v1414_v49  ;;  %v1619_v49 = vsel %vm1153_vm9, %v993_v47, 0 }
 0x573   : > { %1628 = vmatpush.bf16.msrb.mxu2 %v1619_v49  ;;  %v3650_v49 = vld [vmem:[%s3404_s21 + $0x8] sm:$0xff] }
 0x574   : > { %v1419_v51 = vmul.f32 1.442695, %v1416_v50 }
 0x576   : > { %3179 = vpow2.f32 %v1419_v51 }
 0x578   : > { %v3582_v22 = vpop.f32.mrf.mxu3 }
 0x579   : > { %v1457_v11 = vpop.permute.xlu2 %1456 }
 0x57a   : > { %v1462_v52 = vsel %vm1153_vm9, %v1457_v11, 0 }
 0x57b   : > { %1471 = vmatpush.bf16.msra.mxu0 %v1462_v52 }
 0x57c   : > { %v3180_v13 = vpop.eup %3179 }
 0x57d   : > { %v1424_v31 = vsel %vm1085_vm8, %v3180_v13, 0.0 }
 0x57e   : > { %1425 = vadd.xlane.f32.xlu1 %v1424_v31 }
 0x581   : > { %v1548_v53 = vpop.xlane.xlu0 %1547 }
 0x582   : > { %v1552_v5 = vsub.f32 %v1520_v27, %v1548_v53 }
 0x584   : > { %v1554_v23 = vmul.f32 1.442695, %v1552_v5 }
 0x586   : > { %3181 = vpow2.f32 %v1554_v23  ;;  %v1361_v23 = vadd.f32 %v1360_v30, %v3582_v22 }
 0x58c   : > { %v3182_v25 = vpop.eup %3181 }
 0x58d   : > { %v1558_v54 = vsel %vm1085_vm8, %v3182_v25, 0.0 }
 0x58e   : > { %1559 = vadd.xlane.f32.xlu1 %v1558_v54 }
 0x594   : > { %v1573_v56 = vpop.permute.xlu0 %1572 }
 0x595   : > { %v1578_v57 = vsel %vm1153_vm9, %v1573_v56, 0 }
 0x596   : > { %1587 = vmatpush.bf16.msrb.mxu0 %v1578_v57 }
 0x5aa   : > { %v1452_v58 = vpop.f32.mrf.mxu3 }
 0x5b2   : > { %v1454_v60 = vpop.f32.mrf.mxu3 }
 0x5ba   : > { %v1542_v62 = vpop.f32.mrf.mxu3 }
 0x5bb   : > { %v1543_v63 = vadd.f32 %v1542_v62, %v3481_v61 }
 0x5bd   : > { %v1549_v1 = vsel %vm1085_vm8, %v1543_v63, -inf }
 0x5be   : > { %1550 = vmax.xlane.f32.xlu2 %v1549_v1 }
 0x5c2   : > { %v1544_v3 = vpop.f32.mrf.mxu3 }
 0x5f1   : > { %v1426_v4 = vpop.xlane.xlu1 %1425 }
 0x5f2   : > { %3183 = vrcp.f32 %v1426_v4 }
 0x5f8   : > { %v3184_v6 = vpop.eup %3183 }
 0x5f9   : > { %v1430_v8 = vmul.f32 %v3184_v6, %v3180_v13  ;;  %v1637_v13 = vperm.slane %v3424_v44, 5 }
 0x5fb   : > { %v1432_v9 = vadd.f32 %v1430_v8, %v1271_v7  ;;  %v1434_v12 = vpack.c.bf16 %v1430_v8, %v1430_v8 }
 0x5fd   : > { %3001 = vmatmul.msk.bf16.vlgmr.msra.gmra.mxu0 %vm1085_vm8, %v1434_v12  ;;  %v3109_v12 = vld [vmem:[%s837_s23] sm:$0xff] }
 0x601   : > { %v1560_v15 = vpop.xlane.xlu1 %1559 }
 0x602   : > { %3185 = vrcp.f32 %v1560_v15  ;;  %v3636_v15 = vld [vmem:[%s3892_s18] sm:$0xff] }
 0x608   : > { %v3186_v16 = vpop.eup %3185 }
 0x609   : > { %v1566_v61 = vmul.f32 %v3186_v16, %v3182_v25 }
 0x60b   : > { %v1568_v17 = vadd.f32 %v1566_v61, %v1431_v43  ;;  %v1570_v18 = vpack.c.bf16 %v1566_v61, %v1566_v61 }
 0x60d   : > { %v1640_v19 = vmul.f32 0.25, %v1568_v17  ;;  %3005 = vmatmul.msk.bf16.vlgmr.msrb.gmra.mxu0 %vm1085_vm8, %v1570_v18 }
 0x60f   : > { %v2565_v55 = vpack.c.bf16 %v1640_v19, %v1640_v19 }
 0x611   : > { %2568 = vst.msk [vmem:[%s884_s27] sm:$0xf] %vm2567_vm11, %v2565_v55 }
 0x631   : > { %v1551_v59 = vpop.xlane.xlu2 %1550 }
 0x632   : > { %v1553_v14 = vsub.f32 %v1543_v63, %v1551_v59 }
 0x634   : > { %v1556_v20 = vmul.f32 1.442695, %v1553_v14 }
 0x636   : > { %3187 = vpow2.f32 %v1556_v20 }
 0x63c   : > { %v3188_v21 = vpop.eup %3187 }
 0x63d   : > { %v1561_v24 = vsel %vm1085_vm8, %v3188_v21, 0.0 }
 0x63e   : > { %1562 = vadd.xlane.f32.xlu1 %v1561_v24 }
 0x657   : > { %1593 = vrot.lane.b32.xlu1 %v3504_v28, %s3884_s20  ;;  %s832_s20 = scalar_lea.vmem %s3869_s7, %s3407_s22 }
 0x658   : > { %v3108_v16 = vld [vmem:[%s832_s20 + $0x8] sm:$0xff]  ;;  %v3107_v19 = vld [vmem:[%s832_s20] sm:$0xff]  ;;  %s874_s20 = scalar_lea.vmem %s3877_s15, %s3590_s30 }
 0x659   : > { %1733 = vmatpush.bf16.msrb.mxu3 %v3108_v16 }
 0x65d   : > { %1734 = vmatpush.bf16.msrb.mxu3 %v3107_v19 }
 0x67a   : > { %v1473_v32 = vpop.f32.mrf.mxu0 }
 0x67b   : > { %v1477_v33 = vpack.c.bf16 %v1473_v32, %v1452_v58 }
 0x67d   : > { %3002 = vmatmul.msk.bf16.vlgmr.msra.gmra.mxu1 %vm1085_vm8, %v1477_v33 }
 0x682   : > { %v1475_v34 = vpop.f32.mrf.mxu0 }
 0x68a   : > { %v1589_v35 = vpop.f32.mrf.mxu0 }
 0x692   : > { %v1591_v27 = vpop.f32.mrf.mxu0 }
 0x6b1   : > { %v1563_v36 = vpop.xlane.xlu1 %1562 }
 0x6b2   : > { %3189 = vrcp.f32 %v1563_v36 }
 0x6b8   : > { %v3190_v37 = vpop.eup %3189 }
 0x6b9   : > { %v1567_v38 = vmul.f32 %v3190_v37, %v3188_v21  ;;  %v1688_v37 = vperm.slane %v3424_v44, 6 }
 0x6bb   : > { %v1569_v39 = vadd.f32 %v1567_v38, %v1432_v9  ;;  %v1571_v45 = vpack.c.bf16 %v1567_v38, %v1567_v38  ;;  %v3110_v9 = vld [vmem:[%s837_s23 + $0x8] sm:$0xff]  ;;  %s3893_s23 = smov 104  }
 0x6bc   : > { %1768 = vmatpush.bf16.msra.mxu0 %v3110_v9 }
 0x6bd   : > { %v1641_v40 = vmul.f32 0.25, %v1569_v39 }
 0x6bf   : > { %v2566_v28 = vpack.c.bf16 %v1641_v40, %v1641_v40 }
 0x6c0   : > { %1769 = vmatpush.bf16.msra.mxu0 %v3109_v12 }
 0x6c1   : > { %2569 = vst.msk [vmem:[%s884_s27 + $0x4] sm:$0xf] %vm2567_vm11, %v2566_v28  ;;  %v1691_v28 = vperm.slane %v3424_v44, 7 }
 0x6c3   : > { %3029 = vmatmul.msk.bf16.vlgmr.msra.gmra.mxu0 %vm920_vm0, %v3636_v15 }
 0x6c9   : > { %v1594_v42 = vpop.permute.xlu1 %1593 }
 0x6ca   : > { %v1599_v43 = vsel %vm1153_vm9, %v1594_v42, 0 }
 0x6cb   : > { %1608 = vmatpush.bf16.msrb.mxu1 %v1599_v43 }
 0x6ce   : > { %3006 = vmatmul.msk.bf16.vlgmr.msrb.gmra.mxu1 %vm1085_vm8, %v1571_v45 }
 0x6fa   : > { %v1493_v41 = vpop.f32.mrf.mxu1 }
 0x6fb   : > { %v1498_v46 = vadd.f32 %v1493_v41, %v3576_v48 }
 0x702   : > { %v1495_v50 = vpop.f32.mrf.mxu1 }
 0x703   : > { %v1499_v48 = vadd.f32 %v1495_v50, %v1361_v23  ;;  %v1741_v50 = vperm.slane %v3650_v49, 1 }
 0x74b   : > { %v1610_v51 = vpop.f32.mrf.mxu1 }
 0x74c   : > { %v1614_v11 = vpack.c.bf16 %v1610_v51, %v1589_v35  ;;  %v1771_v51 = vpop.f32.mrf.mxu0 }
 0x74e   : > { %3007 = vmatmul.msk.bf16.vlgmr.msrb.gmra.mxu2 %vm1085_vm8, %v1614_v11  ;;  %v1772_v11 = vadd.f32 %v1771_v51, %v1741_v50 }
 0x753   : > { %v1612_v52 = vpop.f32.mrf.mxu1 }
 0x754   : > { %v1805_v52 = vpack.c.bf16 %v1772_v11, %v1772_v11 }
 0x7d1   : > { %v1630_v31 = vpop.f32.mrf.mxu2 }
 0x7d2   : > { %v1635_v53 = vadd.f32 %v1630_v31, %v1498_v46  ;;  %v1918_v31 = vunpack.c.l.b16 %v1805_v52 }
 0x7d4   : > { %v1638_v5 = vadd.f32 %v1637_v13, %v1635_v53  ;;  %v3654_v44 = vpack.c.b16 %v1918_v31, %v1918_v31  ;;  %v1773_v53 = vpop.f32.mrf.mxu0 }
 0x7d6   : > { %v3614_v25 = vadd.f32 %v1638_v5, %v3377_v0  ;;  %v1774_v5 = vadd.f32 %v1773_v53, %v1741_v50 }
 0x7d8   : > { %v1644_v54 = vsel %vm920_vm0, %v3614_v25, 0.0  ;;  %v1806_v23 = vpack.c.bf16 %v1774_v5, %v1774_v5 }
 0x7d9   : > { %1645 = vadd.xlane.f32.xlu2 %v1644_v54  ;;  %v1632_v56 = vpop.f32.mrf.mxu2  ;;  %v1711_v54 = vperm.slane %v3650_v49, 0 }
 0x7da   : > { %v1636_v57 = vadd.f32 %v1632_v56, %v1499_v48  ;;  %v1832_v48 = vsel %vm1085_vm8, %v1806_v23, 0 }
 0x7db   : > { %1841 = vmatpush.bf16.xpose.msra.mxu3 %v1832_v48 }
 0x7dc   : > { %v1639_v58 = vadd.f32 %v1637_v13, %v1636_v57  ;;  %v1813_v13 = vsel %vm1085_vm8, %v1805_v52, 0 }
 0x7dd   : > { %1822 = vmatpush.bf16.xpose.msra.mxu2 %v1813_v13 }
 0x7de   : > { %v3619_v60 = vadd.f32 %v1639_v58, %v3384_v2 }
 0x7e0   : > { %v1647_v62 = vsel %vm920_vm0, %v3619_v60, 0.0 }
 0x7e1   : > { %1648 = vadd.xlane.f32.xlu0 %v1647_v62 }
 0x84c   : > { %v1646_v22 = vpop.xlane.xlu2 %1645 }
 0x84d   : > { %v1650_v0 = vmul.f32 %v1646_v22, %v3388_v10 }
 0x84f   : > { %v1652_v63 = vsub.f32 %v3614_v25, %v1650_v0 }
 0x851   : > { %v1654_v1 = vmul.f32 %v1652_v63, %v1652_v63 }
 0x853   : > { %v1656_v3 = vsel %vm920_vm0, %v1654_v1, 0.0  ;;  %v1947_v1 = vunpack.c.l.b16 %v1806_v23 }
 0x854   : > { %1657 = vadd.xlane.f32.xlu2 %v1656_v3  ;;  %v1649_v4 = vpop.xlane.xlu0 %1648 }
 0x855   : > { %v1651_v6 = vmul.f32 %v1649_v4, %v3388_v10 }
 0x857   : > { %v1653_v2 = vsub.f32 %v3619_v60, %v1651_v6  ;;  %v3666_v6 = vpack.c.b16 %v1947_v1, %v1947_v1 }
 0x859   : > { %v1655_v7 = vmul.f32 %v1653_v2, %v1653_v2 }
 0x85b   : > { %v1659_v8 = vsel %vm920_vm0, %v1655_v7, 0.0 }
 0x85c   : > { %1660 = vadd.xlane.f32.xlu1 %v1659_v8 }
 0x86c   : > { %1920 = vrot.lane.b32.xlu2 %v3654_v44, %s3260_s25 }
 0x8c7   : > { %v1658_v61 = vpop.xlane.xlu2 %1657 }
 0x8c8   : > { %v1662_v17 = vmul.f32 %v1658_v61, %v3388_v10  ;;  %v3112_v61 = vld [vmem:[%s842_s1 + $0x8] sm:$0xff] }
 0x8c9   : > { %1795 = vmatpush.bf16.msra.mxu1 %v3112_v61 }
 0x8ca   : > { %v1664_v18 = vadd.f32 1e-05, %v1662_v17  ;;  %v3111_v17 = vld [vmem:[%s842_s1] sm:$0xff] }
 0x8cc   : > { %3191 = vrsqrt.f32 %v1664_v18  ;;  %vm1672_vm13 = vweird.f32 %v1664_v18 }
 0x8cd   : > { %1796 = vmatpush.bf16.msra.mxu1 %v3111_v17 }
 0x8cf   : > { %v1661_v55 = vpop.xlane.xlu1 %1660  ;;  %v1921_v7 = vpop.permute.xlu2 %1920 }
 0x8d0   : > { %v1663_v59 = vmul.f32 %v1661_v55, %v3388_v10  ;;  %v1926_v8 = vsel %vm1085_vm8, %v1921_v7, 0  ;;  %3038 = vmatmul.msk.bf16.vlgmr.msra.gmra.mxu1 %vm920_vm0, %v3636_v15 }
 0x8d1   : > { %1935 = vmatpush.bf16.xpose.msrb.mxu2 %v1926_v8 }
 0x8d2   : > { %v3192_v14 = vpop.eup %3191  ;;  %v1665_v20 = vadd.f32 1e-05, %v1663_v59 }
 0x8d3   : > { %v1667_v21 = vmul.f32 %v3192_v14, %v1664_v18  ;;  %vm1673_vm12 = vweird.f32 %v3192_v14 }
 0x8d4   : > { %3193 = vrsqrt.f32 %v1665_v20  ;;  %vm1674_vm14 = vmor %vm1672_vm13, %vm1673_vm12  ;;  %vm1682_vm1 = vweird.f32 %v1665_v20  ;;  %vm2562_vm13 = vcmask 257024  }
 0x8d5   : > { %v1668_v24 = vmul.f32 %v3192_v14, %v1667_v21 }
 0x8d7   : > { %v1669_v26 = vmul.f32 0.5, %v1668_v24 }
 0x8d9   : > { %v1670_v29 = vsub.f32 1.5, %v1669_v26 }
 0x8da   : > { %v3194_v30 = vpop.eup %3193 }
 0x8db   : > { %v1671_v32 = vmul.f32 %v3192_v14, %v1670_v29  ;;  %v1677_v33 = vmul.f32 %v3194_v30, %v1665_v20  ;;  %vm1683_vm15 = vweird.f32 %v3194_v30  ;;  %v1776_v29 = vperm.slane %v3650_v49, 2 }
 0x8dc   : > { %vm1684_vm2 = vmor %vm1682_vm1, %vm1683_vm15 }
 0x8dd   : > { %v1678_v34 = vmul.f32 %v3194_v30, %v1677_v33  ;;  %v1675_v35 = vsel %vm1674_vm14, %v3192_v14, %v1671_v32 }
 0x8de   : > { %v1686_v38 = vmul.f32 %v1675_v35, %v1652_v63 }
 0x8df   : > { %v1679_v27 = vmul.f32 0.5, %v1678_v34 }
 0x8e0   : > { %v1689_v42 = vmul.f32 %v1688_v37, %v1686_v38 }
 0x8e1   : > { %v1680_v36 = vsub.f32 1.5, %v1679_v27 }
 0x8e2   : > { %v1692_v41 = vadd.f32 %v1691_v28, %v1689_v42 }
 0x8e3   : > { %v1681_v39 = vmul.f32 %v3194_v30, %v1680_v36 }
 0x8e5   : > { %v1685_v40 = vsel %vm1684_vm2, %v3194_v30, %v1681_v39 }
 0x8e6   : > { %v1687_v43 = vmul.f32 %v1685_v40, %v1653_v2 }
 0x8e8   : > { %v1690_v45 = vmul.f32 %v1688_v37, %v1687_v43 }
 0x8ea   : > { %v1693_v46 = vadd.f32 %v1691_v28, %v1690_v45 }
 0x8ec   : > { %v1710_v47 = vpack.c.bf16 %v1693_v46, %v1692_v41 }
 0x8ee   : > { %3016 = vmatmul.msk.bf16.vlgmr.msrb.gmra.mxu3 %vm920_vm0, %v1710_v47 }
 0x94d   : > { %v1798_v30 = vpop.f32.mrf.mxu1 }
 0x94e   : > { %v1799_v32 = vadd.f32 %v1798_v30, %v1776_v29 }
 0x950   : > { %v1807_v33 = vpack.c.bf16 %v1799_v32, %v1799_v32 }
 0x952   : > { %v1877_v35 = vsel %vm1153_vm9, %v1807_v33, 0  ;;  %v1997_v40 = vunpack.c.l.b16 %v1807_v33 }
 0x953   : > { %1886 = vmatpush.bf16.msrb.mxu0 %v1877_v35 }
 0x954   : > { %v3691_v28 = vpack.c.b16 %v1997_v40, %v1997_v40 }
 0x955   : > { %v1800_v42 = vpop.f32.mrf.mxu1 }
 0x956   : > { %v1801_v43 = vadd.f32 %v1800_v42, %v1776_v29 }
 0x958   : > { %v1808_v45 = vpack.c.bf16 %v1801_v43, %v1801_v43 }
 0x95a   : > { %v1896_v41 = vsel %vm1153_vm9, %v1808_v45, 0 }
 0x95b   : > { %1905 = vmatpush.bf16.msrb.mxu1 %v1896_v41 }
 0x971   : > { %v1736_v56 = vpop.f32.mrf.mxu3 }
 0x972   : > { %v1737_v57 = vadd.f32 %v1736_v56, %v1711_v54 }
 0x974   : > { %v1803_v58 = vpack.c.bf16 %v1737_v57, %v1737_v57 }
 0x976   : > { %v1913_v62 = vunpack.c.l.b16 %v1803_v58  ;;  %3039 = vmatmul.msk.bf16.vlgmr.msra.gmra.mxu2 %vm1085_vm8, %v1803_v58 }
 0x978   : > { %v3661_v22 = vpack.c.b16 %v1913_v62, %v1913_v62 }
 0x979   : > { %v1738_v0 = vpop.f32.mrf.mxu3 }
 0x97a   : > { %v1739_v63 = vadd.f32 %v1738_v0, %v1711_v54  ;;  %1915 = vrot.lane.b32.xlu2 %v3661_v22, %s3260_s25 }
 0x97c   : > { %v1804_v3 = vpack.c.bf16 %v1739_v63, %v1739_v63 }
 0x97e   : > { %v1942_v4 = vunpack.c.l.b16 %v1804_v3  ;;  %3040 = vmatmul.msk.bf16.vlgmr.msra.gmra.mxu3 %vm1085_vm8, %v1804_v3  ;;  %v2021_v3 = vunpack.c.l.b16 %v1808_v45 }
 0x980   : > { %v3668_v2 = vpack.c.b16 %v1942_v4, %v1942_v4 }
 0x982   : > { %1944 = vrot.lane.b32.xlu0 %v3668_v2, %s3260_s25  ;;  %1949 = vrot.lane.b32.xlu2 %v3666_v6, %s3260_s25 }
 0x9d4   : > { %v1916_v9 = vpop.permute.xlu2 %1915 }
 0x9d5   : > { %3043 = vmatmul.msk.bf16.vlgmr.msrb.gmra.mxu2 %vm1085_vm8, %v1916_v9  ;;  %v3721_v9 = vpack.c.b16 %v2021_v3, %v2021_v3 }
 0x9dc   : > { %v1950_v12 = vpop.permute.xlu2 %1949 }
 0x9dd   : > { %v1955_v16 = vsel %vm1085_vm8, %v1950_v12, 0 }
 0x9de   : > { %1964 = vmatpush.bf16.xpose.msrb.mxu3 %v1955_v16 }
 0x9f4   : > { %v1945_v18 = vpop.permute.xlu0 %1944 }
 0x9f5   : > { %3044 = vmatmul.msk.bf16.vlgmr.msrb.gmra.mxu3 %vm1085_vm8, %v1945_v18 }
 0x9f9   : > { %v1824_v19 = vpop.f32.mrf.mxu2 }
 0x9fa   : > { %v1847_v55 = vsel %vm1085_vm8, %v1824_v19, -inf }
 0x9fb   : > { %1848 = vmax.xlane.f32.xlu1 %v1847_v55 }
 0xa01   : > { %v1826_v59 = vpop.f32.mrf.mxu2  ;;  %v1843_v14 = vpop.f32.mrf.mxu3 }
 0xa02   : > { %v1850_v46 = vsel %vm1085_vm8, %v1843_v14, -inf }
 0xa09   : > { %v1845_v20 = vpop.f32.mrf.mxu3 }
 0xa58   : > { %v1937_v21 = vpop.f32.mrf.mxu2 }
 0xa59   : > { %v1970_v24 = vsel %vm1085_vm8, %v1937_v21, -inf }
 0xa5a   : > { %1971 = vmax.xlane.f32.xlu2 %v1970_v24 }
 0xa60   : > { %v1939_v26 = vpop.f32.mrf.mxu2 }
 0xa6e   : > { %v1849_v15 = vpop.xlane.xlu1 %1848 }
 0xa6f   : > { %v1853_v34 = vsub.f32 %v1824_v19, %v1849_v15 }
 0xa71   : > { %v1855_v27 = vmul.f32 1.442695, %v1853_v34 }
 0xa72   : > { %2085 = vrot.lane.b32.xlu2 %v3661_v22, %s3262_s0 }
 0xa73   : > { %3195 = vpow2.f32 %v1855_v27 }
 0xa78   : > { %v1966_v36 = vpop.f32.mrf.mxu3 }
 0xa79   : > { %v3196_v37 = vpop.eup %3195  ;;  %v1973_v13 = vsel %vm1085_vm8, %v1966_v36, -inf }
 0xa7a   : > { %v1859_v38 = vsel %vm1085_vm8, %v3196_v37, 0.0 }
 0xa7b   : > { %1860 = vadd.xlane.f32.xlu1 %v1859_v38 }
 0xa80   : > { %v1968_v39 = vpop.f32.mrf.mxu3 }
 0xa94   : > { %1999 = vrot.lane.b32.xlu1 %v3691_v28, %s3260_s25 }
 0xa9c   : > { %2087 = vrot.lane.b32.xlu1 %v3654_v44, %s3262_s0 }
 0xac6   : > { %1851 = vmax.xlane.f32.xlu1 %v1850_v46 }
 0xacd   : > { %v1972_v47 = vpop.xlane.xlu2 %1971 }
 0xace   : > { %v1976_v50 = vsub.f32 %v1937_v21, %v1972_v47 }
 0xad0   : > { %v1978_v51 = vmul.f32 1.442695, %v1976_v50 }
 0xad2   : > { %3197 = vpow2.f32 %v1978_v51 }
 0xad5   : > { %v2086_v17 = vpop.permute.xlu2 %2085 }
 0xad8   : > { %v3198_v11 = vpop.eup %3197 }
 0xad9   : > { %v1982_v52 = vsel %vm1085_vm8, %v3198_v11, 0.0 }
 0xada   : > { %1983 = vadd.xlane.f32.xlu0 %v1982_v52 }
 0xadf   : > { %2110 = vrot.lane.b32.xlu1 %v3666_v6, %s3262_s0 }
 0xae2   : > { %1974 = vmax.xlane.f32.xlu0 %v1973_v13 }
 0xae7   : > { %2224 = vrot.lane.b32.xlu1 %v3654_v44, %s3893_s23 }
 0xaee   : > { %v1861_v31 = vpop.xlane.xlu1 %1860 }
 0xaef   : > { %3199 = vrcp.f32 %v1861_v31  ;;  %2247 = vrot.lane.b32.xlu1 %v3666_v6, %s3893_s23 }
 0xaf5   : > { %v3200_v53 = vpop.eup %3199 }
 0xaf6   : > { %v3707_v5 = vmul.f32 %v3200_v53, %v3196_v37 }
 0xaf7   : > { %2222 = vrot.lane.b32.xlu1 %v3661_v22, %s3893_s23 }
 0xaf8   : > { %v1871_v23 = vpack.c.bf16 %v3707_v5, %v3707_v5 }
 0xafa   : > { %3041 = vmatmul.msk.bf16.vlgmr.msrb.gmra.mxu0 %vm1085_vm8, %v1871_v23 }
 0xb06   : > { %v2000_v48 = vpop.permute.xlu1 %1999 }
 0xb07   : > { %v2005_v54 = vsel %vm1153_vm9, %v2000_v48, 0 }
 0xb08   : > { %2014 = vmatpush.bf16.msra.mxu0 %v2005_v54 }
 0xb0e   : > { %v2088_v44 = vpop.permute.xlu1 %2087 }
 0xb0f   : > { %v2093_v56 = vsel %vm1085_vm8, %v2088_v44, 0 }
 0xb10   : > { %2102 = vmatpush.bf16.xpose.msrb.mxu0 %v2093_v56 }
 0xb39   : > { %v1852_v57 = vpop.xlane.xlu1 %1851 }
 0xb3a   : > { %v1854_v58 = vsub.f32 %v1843_v14, %v1852_v57 }
 0xb3c   : > { %v1857_v62 = vmul.f32 1.442695, %v1854_v58 }
 0xb3e   : > { %3201 = vpow2.f32 %v1857_v62 }
 0xb44   : > { %v3202_v0 = vpop.eup %3201 }
 0xb45   : > { %v1862_v22 = vsel %vm1085_vm8, %v3202_v0, 0.0 }
 0xb46   : > { %1863 = vadd.xlane.f32.xlu0 %v1862_v22 }
 0xb4d   : > { %v1984_v63 = vpop.xlane.xlu0 %1983 }
 0xb4e   : > { %3203 = vrcp.f32 %v1984_v63 }
 0xb51   : > { %v2111_v26 = vpop.permute.xlu1 %2110 }
 0xb52   : > { %v2116_v32 = vsel %vm1085_vm8, %v2111_v26, 0 }
 0xb54   : > { %v3204_v1 = vpop.eup %3203 }
 0xb55   : > { %v3717_v4 = vmul.f32 %v3204_v1, %v3198_v11  ;;  %v1975_v6 = vpop.xlane.xlu0 %1974 }
 0xb56   : > { %v1977_v7 = vsub.f32 %v1966_v36, %v1975_v6 }
 0xb57   : > { %v1994_v8 = vpack.c.bf16 %v3717_v4, %v3717_v4 }
 0xb58   : > { %v1980_v12 = vmul.f32 1.442695, %v1977_v7 }
 0xb59   : > { %3045 = vmatmul.msk.bf16.vlgmr.msra.gmra.mxu0 %vm1085_vm8, %v1994_v8  ;;  %v2225_v36 = vpop.permute.xlu1 %2224 }
 0xb5a   : > { %3205 = vpow2.f32 %v1980_v12  ;;  %2023 = vrot.lane.b32.xlu0 %v3721_v9, %s3260_s25  ;;  %s3736_s25 = scalar_lea.vmem %s3872_s10, %s3407_s22  ;;  %v2230_v42 = vsel %vm1085_vm8, %v2225_v36, 0  ;;  %s3096_s22 = sshll.u32 %s3900_s24, 5 }
 0xb5b   : > { %v1707_v59 = vld [vmem:[%s3736_s25 + $0x4] sm:$0xf]  ;;  %v1706_v51 = vld [vmem:[%s3736_s25] sm:$0xf]  ;;  %v1708_v7 = vld [vmem:[%s3736_s25 + $0x8] sm:$0xf] }
 0xb5c   : > { %v2049_v14 = vsel %vm1153_vm9, %v1707_v59, 0  ;;  %v2069_v11 = vsel %vm1153_vm9, %v1706_v51, 0  ;;  %v2204_v8 = vsel %vm1153_vm9, %v1708_v7, 0 }
 0xb5d   : > { %2058 = vmatpush.bf16.msra.mxu2 %v2049_v14  ;;  %2078 = vmatpush.bf16.msra.mxu3 %v2069_v11 }
 0xb5e   : > { %2213 = vmatpush.bf16.msra.mxu0 %v2204_v8 }
 0xb60   : > { %v3206_v16 = vpop.eup %3205 }
 0xb61   : > { %v1985_v61 = vsel %vm1085_vm8, %v3206_v16, 0.0  ;;  %v2248_v47 = vpop.permute.xlu1 %2247 }
 0xb62   : > { %1986 = vadd.xlane.f32.xlu2 %v1985_v61  ;;  %2108 = vrot.lane.b32.xlu0 %v3668_v2, %s3262_s0  ;;  %v2253_v56 = vsel %vm1085_vm8, %v2248_v47, 0 }
 0xb69   : > { %3049 = vmatmul.msk.bf16.vlgmr.msrb.gmra.mxu0 %vm1085_vm8, %v2086_v17  ;;  %v2223_v50 = vpop.permute.xlu1 %2222 }
 0xb77   : > { %v1888_v18 = vpop.f32.mrf.mxu0 }
 0xb7a   : > { %2157 = vrot.lane.b32.xlu2 %v3691_v28, %s3262_s0 }
 0xb7f   : > { %v1890_v19 = vpop.f32.mrf.mxu0 }
 0xbb9   : > { %v1864_v55 = vpop.xlane.xlu0 %1863 }
 0xbba   : > { %3207 = vrcp.f32 %v1864_v55 }
 0xbc0   : > { %v3208_v20 = vpop.eup %3207 }
 0xbc1   : > { %v1868_v21 = vmul.f32 %v3208_v20, %v3202_v0 }
 0xbc3   : > { %v1872_v24 = vpack.c.bf16 %v1868_v21, %v1868_v21 }
 0xbc5   : > { %3042 = vmatmul.msk.bf16.vlgmr.msrb.gmra.mxu1 %vm1085_vm8, %v1872_v24 }
 0xbcc   : > { %v2024_v29 = vpop.permute.xlu0 %2023 }
 0xbcd   : > { %v2029_v30 = vsel %vm1153_vm9, %v2024_v29, 0 }
 0xbce   : > { %2038 = vmatpush.bf16.msra.mxu1 %v2029_v30 }
 0xbd2   : > { %2125 = vmatpush.bf16.xpose.msrb.mxu1 %v2116_v32 }
 0xbd4   : > { %v2109_v46 = vpop.permute.xlu0 %2108 }
 0xbd5   : > { %v1987_v15 = vpop.xlane.xlu2 %1986 }
 0xbd6   : > { %3209 = vrcp.f32 %v1987_v15  ;;  %v2016_v33 = vpop.f32.mrf.mxu0 }
 0xbdc   : > { %v3210_v34 = vpop.eup %3209 }
 0xbdd   : > { %v1991_v35 = vmul.f32 %v3210_v34, %v3206_v16  ;;  %v2158_v27 = vpop.permute.xlu2 %2157  ;;  %v1992_v16 = vadd.f32 %v3717_v4, %v3707_v5 }
 0xbde   : > { %v2163_v37 = vsel %vm1153_vm9, %v2158_v27, 0  ;;  %v2018_v38 = vpop.f32.mrf.mxu0 }
 0xbdf   : > { %v3744_v39 = vadd.f32 %v1991_v35, %v1868_v21  ;;  %v1995_v40 = vpack.c.bf16 %v1991_v35, %v1991_v35  ;;  %2172 = vmatpush.bf16.msrb.mxu2 %v2163_v37 }
 0xbe1   : > { %3046 = vmatmul.msk.bf16.vlgmr.msra.gmra.mxu1 %vm1085_vm8, %v1995_v40 }
 0xbe2   : > { %2239 = vmatpush.bf16.xpose.msra.mxu1 %v2230_v42 }
 0xbe6   : > { %v2104_v43 = vpop.f32.mrf.mxu0 }
 0xbe7   : > { %v2131_v45 = vsel %vm1085_vm8, %v2104_v43, -inf }
 0xbe8   : > { %2132 = vmax.xlane.f32.xlu0 %v2131_v45 }
 0xbee   : > { %v2106_v41 = vpop.f32.mrf.mxu0 }
 0xbf1   : > { %3050 = vmatmul.msk.bf16.vlgmr.msrb.gmra.mxu1 %vm1085_vm8, %v2109_v46 }
 0xc01   : > { %3054 = vmatmul.msk.bf16.vlgmr.msra.gmra.mxu1 %vm1085_vm8, %v2223_v50 }
 0xc42   : > { %v1907_v52 = vpop.f32.mrf.mxu1 }
 0xc43   : > { %v1911_v13 = vpack.c.bf16 %v1907_v52, %v1888_v18 }
 0xc45   : > { %3048 = vmatmul.msk.bf16.vlgmr.msra.gmra.mxu3 %vm1085_vm8, %v1911_v13 }
 0xc4a   : > { %v1909_v31 = vpop.f32.mrf.mxu1 }
 0xc5b   : > { %v2133_v53 = vpop.xlane.xlu0 %2132 }
 0xc5c   : > { %v2137_v23 = vsub.f32 %v2104_v43, %v2133_v53 }
 0xc5e   : > { %v2139_v48 = vmul.f32 1.442695, %v2137_v23  ;;  %v2040_v54 = vpop.f32.mrf.mxu1 }
 0xc5f   : > { %v2044_v44 = vpack.c.bf16 %v2040_v54, %v2016_v33 }
 0xc60   : > { %3211 = vpow2.f32 %v2139_v48 }
 0xc61   : > { %3047 = vmatmul.msk.bf16.vlgmr.msra.gmra.mxu2 %vm1085_vm8, %v2044_v44 }
 0xc62   : > { %2262 = vmatpush.bf16.xpose.msra.mxu2 %v2253_v56 }
 0xc66   : > { %v3212_v57 = vpop.eup %3211  ;;  %v2042_v58 = vpop.f32.mrf.mxu1 }
 0xc67   : > { %v2143_v62 = vsel %vm1085_vm8, %v3212_v57, 0.0 }
 0xc68   : > { %2144 = vadd.xlane.f32.xlu2 %v2143_v62 }
 0xc6e   : > { %v2127_v0 = vpop.f32.mrf.mxu1 }
 0xc6f   : > { %v2134_v22 = vsel %vm1085_vm8, %v2127_v0, -inf }
 0xc70   : > { %2135 = vmax.xlane.f32.xlu1 %v2134_v22 }
 0xc76   : > { %v2129_v63 = vpop.f32.mrf.mxu1 }
 0xc7e   : > { %v2241_v1 = vpop.f32.mrf.mxu1 }
 0xc7f   : > { %v2268_v4 = vsel %vm1085_vm8, %v2241_v1, -inf }
 0xc80   : > { %2245 = vrot.lane.b32.xlu2 %v3668_v2, %s3893_s23 }
 0xc86   : > { %v2243_v3 = vpop.f32.mrf.mxu1 }
 0xc88   : > { %2178 = vrot.lane.b32.xlu2 %v3721_v9, %s3262_s0  ;;  %s857_s0 = scalar_lea.vmem %s3874_s12, %s3096_s22 }
 0xc89   : > { %2315 = vrot.lane.b32.xlu1 %v3721_v9, %s3893_s23 }
 0xcc8   : > { %v2080_v18 = vpop.f32.mrf.mxu3 }
 0xcd0   : > { %v2082_v50 = vpop.f32.mrf.mxu3 }
 0xcdb   : > { %v2145_v6 = vpop.xlane.xlu2 %2144 }
 0xcdc   : > { %3213 = vrcp.f32 %v2145_v6 }
 0xce2   : > { %v3214_v12 = vpop.eup %3213 }
 0xce3   : > { %v2151_v61 = vmul.f32 %v3214_v12, %v3212_v57  ;;  %v2136_v17 = vpop.xlane.xlu1 %2135  ;;  %v2246_v2 = vpop.permute.xlu2 %2245 }
 0xce4   : > { %v2138_v19 = vsub.f32 %v2127_v0, %v2136_v17  ;;  %v2060_v55 = vpop.f32.mrf.mxu2 }
 0xce5   : > { %v2153_v59 = vadd.f32 %v2151_v61, %v1992_v16  ;;  %v2155_v14 = vpack.c.bf16 %v2151_v61, %v2151_v61  ;;  %v2081_v20 = vadd.f32 %v2080_v18, %v2060_v55  ;;  %v1709_v61 = vld [vmem:[%s3736_s25 + $0xc] sm:$0xf] }
 0xce6   : > { %v2141_v9 = vmul.f32 1.442695, %v2138_v19  ;;  %v2341_v17 = vsel %vm1153_vm9, %v1709_v61, 0  ;;  %v3118_v61 = vld [vmem:[%s857_s0 + $0x18] sm:$0xff] }
 0xce7   : > { %3051 = vmatmul.msk.bf16.vlgmr.msrb.gmra.mxu2 %vm1085_vm8, %v2155_v14  ;;  %2350 = vmatpush.bf16.msrb.mxu1 %v2341_v17  ;;  %v3117_v17 = vld [vmem:[%s857_s0 + $0x10] sm:$0xff] }
 0xce8   : > { %3215 = vpow2.f32 %v2141_v9 }
 0xceb   : > { %v2179_v21 = vpop.permute.xlu2 %2178 }
 0xcec   : > { %v2184_v24 = vsel %vm1153_vm9, %v2179_v21, 0  ;;  %v3774_v32 = vpop.f32.mrf.mxu2 }
 0xced   : > { %2193 = vmatpush.bf16.msrb.mxu3 %v2184_v24 }
 0xcee   : > { %v3216_v26 = vpop.eup %3215 }
 0xcef   : > { %v2146_v5 = vsel %vm1085_vm8, %v3216_v26, 0.0 }
 0xcf0   : > { %2147 = vadd.xlane.f32.xlu0 %v2146_v5 }
 0xcf7   : > { %3055 = vmatmul.msk.bf16.vlgmr.msra.gmra.mxu2 %vm1085_vm8, %v2246_v2 }
 0xcf8   : > { %2269 = vmax.xlane.f32.xlu0 %v2268_v4 }
 0xcfb   : > { %v2316_v29 = vpop.permute.xlu1 %2315 }
 0xcfc   : > { %v2321_v30 = vsel %vm1153_vm9, %v2316_v29, 0 }
 0xcfd   : > { %2330 = vmatpush.bf16.msrb.mxu0 %v2321_v30 }
 0xd63   : > { %v2148_v15 = vpop.xlane.xlu0 %2147 }
 0xd64   : > { %3217 = vrcp.f32 %v2148_v15 }
 0xd6a   : > { %v3218_v33 = vpop.eup %3217  ;;  %v2174_v34 = vpop.f32.mrf.mxu2 }
 0xd6b   : > { %v2152_v35 = vmul.f32 %v3218_v33, %v3216_v26  ;;  %v2270_v27 = vpop.xlane.xlu0 %2269  ;;  %v2083_v26 = vadd.f32 %v2082_v50, %v3774_v32  ;;  %v3113_v50 = vld [vmem:[%s852_s28] sm:$0xff] }
 0xd6c   : > { %v2274_v36 = vsub.f32 %v2241_v1, %v2270_v27 }
 0xd6d   : > { %v2154_v37 = vadd.f32 %v2152_v35, %v3744_v39  ;;  %v2156_v38 = vpack.c.bf16 %v2152_v35, %v2152_v35 }
 0xd6e   : > { %v2276_v40 = vmul.f32 1.442695, %v2274_v36 }
 0xd6f   : > { %3052 = vmatmul.msk.bf16.vlgmr.msrb.gmra.mxu3 %vm1085_vm8, %v2156_v38 }
 0xd70   : > { %3219 = vpow2.f32 %v2276_v40 }
 0xd72   : > { %v2176_v42 = vpop.f32.mrf.mxu2 }
 0xd76   : > { %v3220_v43 = vpop.eup %3219 }
 0xd77   : > { %v2280_v45 = vsel %vm1085_vm8, %v3220_v43, 0.0 }
 0xd78   : > { %2281 = vadd.xlane.f32.xlu0 %v2280_v45  ;;  %v3114_v45 = vld [vmem:[%s852_s28 + $0x8] sm:$0xff] }
 0xd79   : > { %2446 = vmatpush.bf16.msrb.mxu2 %v3114_v45 }
 0xd7a   : > { %v2264_v41 = vpop.f32.mrf.mxu2 }
 0xd7b   : > { %v2271_v46 = vsel %vm1085_vm8, %v2264_v41, -inf }
 0xd7c   : > { %2272 = vmax.xlane.f32.xlu2 %v2271_v46 }
 0xd7d   : > { %2447 = vmatpush.bf16.msrb.mxu2 %v3113_v50 }
 0xd82   : > { %v2266_v47 = vpop.f32.mrf.mxu2 }
 0xdeb   : > { %v2282_v51 = vpop.xlane.xlu0 %2281 }
 0xdec   : > { %3221 = vrcp.f32 %v2282_v51 }
 0xdef   : > { %v2273_v39 = vpop.xlane.xlu2 %2272 }
 0xdf0   : > { %v2275_v11 = vsub.f32 %v2264_v41, %v2273_v39 }
 0xdf2   : > { %v3222_v52 = vpop.eup %3221  ;;  %v2278_v13 = vmul.f32 1.442695, %v2275_v11  ;;  %v2195_v31 = vpop.f32.mrf.mxu3 }
 0xdf3   : > { %v2288_v53 = vmul.f32 %v3222_v52, %v3220_v43  ;;  %v2199_v23 = vpack.c.bf16 %v2195_v31, %v2174_v34 }
 0xdf4   : > { %3223 = vpow2.f32 %v2278_v13 }
 0xdf5   : > { %v2290_v48 = vadd.f32 %v2288_v53, %v2153_v59  ;;  %3053 = vmatmul.msk.bf16.vlgmr.msra.gmra.mxu0 %vm1085_vm8, %v2199_v23 }
 0xdf7   : > { %v2362_v54 = vmul.f32 0.25, %v2290_v48 }
 0xdf9   : > { %v2570_v44 = vpack.c.bf16 %v2362_v54, %v2362_v54 }
 0xdfa   : > { %v3224_v56 = vpop.eup %3223  ;;  %v2197_v57 = vpop.f32.mrf.mxu3 }
 0xdfb   : > { %2572 = vst.msk [vmem:[%s894_s26] sm:$0xf] %vm2567_vm11, %v2570_v44  ;;  %v2283_v58 = vsel %vm1085_vm8, %v3224_v56, 0.0 }
 0xdfc   : > { %2284 = vadd.xlane.f32.xlu0 %v2283_v58 }
 0xe10   : > { %2294 = vrot.lane.b32.xlu0 %v3691_v28, %s3893_s23  ;;  %v2292_v28 = vpack.c.bf16 %v2288_v53, %v2288_v53 }
 0xe6f   : > { %v2285_v62 = vpop.xlane.xlu0 %2284 }
 0xe70   : > { %3225 = vrcp.f32 %v2285_v62 }
 0xe72   : > { %v2215_v0 = vpop.f32.mrf.mxu0 }
 0xe73   : > { %v2220_v22 = vadd.f32 %v2215_v0, %v2081_v20  ;;  %v2359_v20 = vperm.slane %v3650_v49, 3  ;;  %v2410_v0 = vperm.slane %v3650_v49, 4 }
 0xe76   : > { %v3226_v63 = vpop.eup %3225 }
 0xe77   : > { %v2289_v1 = vmul.f32 %v3226_v63, %v3224_v56 }
 0xe79   : > { %v2291_v3 = vadd.f32 %v2289_v1, %v2154_v37  ;;  %v2293_v6 = vpack.c.bf16 %v2289_v1, %v2289_v1 }
 0xe7a   : > { %v2217_v2 = vpop.f32.mrf.mxu0 }
 0xe7b   : > { %v2363_v7 = vmul.f32 0.25, %v2291_v3  ;;  %3057 = vmatmul.msk.bf16.vlgmr.msrb.gmra.mxu0 %vm1085_vm8, %v2293_v6  ;;  %v2221_v4 = vadd.f32 %v2217_v2, %v2083_v26  ;;  %v2413_v3 = vperm.slane %v3650_v49, 5  ;;  %v3116_v2 = vld [vmem:[%s857_s0 + $0x8] sm:$0xff]  ;;  %v2465_v26 = vperm.slane %v3650_v49, 6 }
 0xe7d   : > { %v2571_v8 = vpack.c.bf16 %v2363_v7, %v2363_v7 }
 0xe7f   : > { %2573 = vst.msk [vmem:[%s894_s26 + $0x4] sm:$0xf] %vm2567_vm11, %v2571_v8 }
 0xe82   : > { %v2295_v12 = vpop.permute.xlu0 %2294 }
 0xe83   : > { %v2300_v16 = vsel %vm1153_vm9, %v2295_v12, 0  ;;  %vm2490_vm9 = vcmask 523264  }
 0xe84   : > { %2309 = vmatpush.bf16.msra.mxu3 %v2300_v16 }
 0xe87   : > { %3056 = vmatmul.msk.bf16.vlgmr.msra.gmra.mxu3 %vm1085_vm8, %v2292_v28 }
 0xe88   : > { %2498 = vmatpush.bf16.msrb.mxu3 %v3118_v61 }
 0xe8c   : > { %2499 = vmatpush.bf16.msrb.mxu3 %v3117_v17 }
 0xe90   : > { %2500 = vmatpush.bf16.msrb.mxu3 %v3116_v2 }
 0xef8   : > { %v2332_v18 = vpop.f32.mrf.mxu0 }
 0xf00   : > { %v2334_v19 = vpop.f32.mrf.mxu0 }
 0xf0a   : > { %v2311_v55 = vpop.f32.mrf.mxu3 }
 0xf0b   : > { %v2336_v59 = vpack.c.bf16 %v2332_v18, %v2311_v55  ;;  %v3115_v18 = vld [vmem:[%s857_s0] sm:$0xff] }
 0xf0c   : > { %2501 = vmatpush.bf16.msrb.mxu3 %v3115_v18  ;;  %v3151_v55 = vld [vmem:[%s860_s19] ss:$0 sm:$0xff] }
 0xf0d   : > { %3058 = vmatmul.msk.bf16.vlgmr.msrb.gmra.mxu1 %vm1085_vm8, %v2336_v59 }
 0xf12   : > { %v2313_v14 = vpop.f32.mrf.mxu3 }
 0xf8a   : > { %v2352_v9 = vpop.f32.mrf.mxu1 }
 0xf8b   : > { %v2357_v21 = vadd.f32 %v2352_v9, %v2220_v22 }
 0xf8d   : > { %v2360_v24 = vadd.f32 %v2359_v20, %v2357_v21 }
 0xf8f   : > { %v3799_v5 = vadd.f32 %v2360_v24, %v3614_v25 }
 0xf91   : > { %v2366_v29 = vsel %vm920_vm0, %v3799_v5, 0.0 }
 0xf92   : > { %2367 = vadd.xlane.f32.xlu0 %v2366_v29  ;;  %v2354_v30 = vpop.f32.mrf.mxu1 }
 0xf93   : > { %v2358_v15 = vadd.f32 %v2354_v30, %v2221_v4 }
 0xf95   : > { %v2361_v33 = vadd.f32 %v2359_v20, %v2358_v15 }
 0xf97   : > { %v3804_v34 = vadd.f32 %v2361_v33, %v3619_v60 }
 0xf99   : > { %v2369_v35 = vsel %vm920_vm0, %v3804_v34, 0.0 }
 0xf9a   : > { %2370 = vadd.xlane.f32.xlu2 %v2369_v35 }
0x1005   : > { %v2368_v32 = vpop.xlane.xlu0 %2367 }
0x1006   : > { %v2372_v25 = vmul.f32 %v2368_v32, %v3388_v10 }
0x1008   : > { %v2374_v27 = vsub.f32 %v3799_v5, %v2372_v25 }
0x100a   : > { %v2376_v36 = vmul.f32 %v2374_v27, %v2374_v27 }
0x100c   : > { %v2378_v37 = vsel %vm920_vm0, %v2376_v36, 0.0 }
0x100d   : > { %2379 = vadd.xlane.f32.xlu2 %v2378_v37  ;;  %v2371_v38 = vpop.xlane.xlu2 %2370 }
0x100e   : > { %v2373_v40 = vmul.f32 %v2371_v38, %v3388_v10 }
0x1010   : > { %v2375_v60 = vsub.f32 %v3804_v34, %v2373_v40 }
0x1012   : > { %v2377_v42 = vmul.f32 %v2375_v60, %v2375_v60 }
0x1014   : > { %v2381_v43 = vsel %vm920_vm0, %v2377_v42, 0.0 }
0x1015   : > { %2382 = vadd.xlane.f32.xlu1 %v2381_v43 }
0x1080   : > { %v2380_v41 = vpop.xlane.xlu2 %2379 }
0x1081   : > { %v2384_v46 = vmul.f32 %v2380_v41, %v3388_v10 }
0x1083   : > { %v2386_v47 = vadd.f32 1e-05, %v2384_v46 }
0x1085   : > { %3227 = vrsqrt.f32 %v2386_v47  ;;  %vm2394_vm4 = vweird.f32 %v2386_v47 }
0x1088   : > { %v2383_v51 = vpop.xlane.xlu1 %2382 }
0x1089   : > { %v2385_v39 = vmul.f32 %v2383_v51, %v3388_v10 }
0x108b   : > { %v3228_v11 = vpop.eup %3227  ;;  %v2387_v52 = vadd.f32 1e-05, %v2385_v39 }
0x108c   : > { %v2389_v13 = vmul.f32 %v3228_v11, %v2386_v47  ;;  %vm2395_vm3 = vweird.f32 %v3228_v11 }
0x108d   : > { %3229 = vrsqrt.f32 %v2387_v52  ;;  %vm2396_vm5 = vmor %vm2394_vm4, %vm2395_vm3  ;;  %vm2404_vm7 = vweird.f32 %v2387_v52 }
0x108e   : > { %v2390_v31 = vmul.f32 %v3228_v11, %v2389_v13 }
0x1090   : > { %v2391_v53 = vmul.f32 0.5, %v2390_v31 }
0x1092   : > { %v2392_v23 = vsub.f32 1.5, %v2391_v53 }
0x1093   : > { %v3230_v48 = vpop.eup %3229 }
0x1094   : > { %v2393_v54 = vmul.f32 %v3228_v11, %v2392_v23  ;;  %v2399_v44 = vmul.f32 %v3230_v48, %v2387_v52  ;;  %vm2405_vm6 = vweird.f32 %v3230_v48 }
0x1095   : > { %vm2406_vm8 = vmor %vm2404_vm7, %vm2405_vm6 }
0x1096   : > { %v2400_v56 = vmul.f32 %v3230_v48, %v2399_v44  ;;  %v2397_v57 = vsel %vm2396_vm5, %v3228_v11, %v2393_v54  ;;  %v2554_v54 = vperm.slane %v3650_v49, 7 }
0x1097   : > { %v2408_v22 = vmul.f32 %v2397_v57, %v2374_v27 }
0x1098   : > { %v2401_v58 = vmul.f32 0.5, %v2400_v56 }
0x1099   : > { %v2411_v6 = vmul.f32 %v2410_v0, %v2408_v22 }
0x109a   : > { %v2402_v62 = vsub.f32 1.5, %v2401_v58 }
0x109b   : > { %v2414_v12 = vadd.f32 %v2413_v3, %v2411_v6 }
0x109c   : > { %v2403_v63 = vmul.f32 %v3230_v48, %v2402_v62 }
0x109e   : > { %v2407_v1 = vsel %vm2406_vm8, %v3230_v48, %v2403_v63 }
0x109f   : > { %v2409_v7 = vmul.f32 %v2407_v1, %v2375_v60 }
0x10a1   : > { %v2412_v8 = vmul.f32 %v2410_v0, %v2409_v7 }
0x10a3   : > { %v2415_v16 = vadd.f32 %v2413_v3, %v2412_v8 }
0x10a5   : > { %v2421_v28 = vpack.c.bf16 %v2415_v16, %v2414_v12 }
0x10a7   : > { %3067 = vmatmul.msk.bf16.vlgmr.msrb.gmra.mxu2 %vm920_vm0, %v2421_v28 }
0x112a   : > { %v2449_v19 = vpop.f32.mrf.mxu2 }
0x112b   : > { %v2450_v59 = vadd.f32 %v3151_v55, %v2449_v19 }
0x112d   : > { %v2454_v9 = vmax.f32 %v2450_v59, 0.0 }
0x1132   : > { %v2451_v14 = vpop.f32.mrf.mxu2 }
0x1133   : > { %v2452_v20 = vadd.f32 %v3151_v55, %v2451_v14 }
0x1135   : > { %v2455_v21 = vmax.f32 %v2452_v20, 0.0 }
0x1137   : > { %v2464_v24 = vpack.c.bf16 %v2455_v21, %v2454_v9 }
0x1139   : > { %3084 = vmatmul.msk.bf16.vlgmr.msrb.gmra.mxu3 %vm2490_vm9, %v2464_v24 }
0x11bc   : > { %v2503_v4 = vpop.f32.mrf.mxu3 }
0x11bd   : > { %v2504_v29 = vadd.f32 %v2503_v4, %v2465_v26 }
0x11bf   : > { %v2508_v30 = vadd.f32 %v2504_v29, %v3799_v5 }
0x11c1   : > { %v2510_v15 = vsel %vm920_vm0, %v2508_v30, 0.0 }
0x11c2   : > { %2511 = vadd.xlane.f32.xlu2 %v2510_v15 }
0x11c4   : > { %v2505_v33 = vpop.f32.mrf.mxu3 }
0x11c5   : > { %v2506_v35 = vadd.f32 %v2505_v33, %v2465_v26 }
0x11c7   : > { %v2509_v32 = vadd.f32 %v2506_v35, %v3804_v34 }
0x11c9   : > { %v2513_v25 = vsel %vm920_vm0, %v2509_v32, 0.0 }
0x11ca   : > { %2514 = vadd.xlane.f32.xlu2 %v2513_v25 }
0x1235   : > { %v2512_v27 = vpop.xlane.xlu2 %2511 }
0x1236   : > { %v2516_v36 = vmul.f32 %v2512_v27, %v3388_v10 }
0x1238   : > { %v2518_v37 = vsub.f32 %v2508_v30, %v2516_v36 }
0x123a   : > { %v2520_v38 = vmul.f32 %v2518_v37, %v2518_v37 }
0x123c   : > { %v2522_v40 = vsel %vm920_vm0, %v2520_v38, 0.0 }
0x123d   : > { %2523 = vadd.xlane.f32.xlu2 %v2522_v40  ;;  %v2515_v60 = vpop.xlane.xlu2 %2514 }
0x123e   : > { %v2517_v5 = vmul.f32 %v2515_v60, %v3388_v10 }
0x1240   : > { %v2519_v42 = vsub.f32 %v2509_v32, %v2517_v5 }
0x1242   : > { %v2521_v43 = vmul.f32 %v2519_v42, %v2519_v42 }
0x1244   : > { %v2525_v45 = vsel %vm920_vm0, %v2521_v43, 0.0 }
0x1245   : > { %2526 = vadd.xlane.f32.xlu2 %v2525_v45 }
0x12b0   : > { %v2524_v34 = vpop.xlane.xlu2 %2523 }
0x12b1   : > { %v2528_v41 = vmul.f32 %v2524_v34, %v3388_v10 }
0x12b3   : > { %v2530_v46 = vadd.f32 1e-05, %v2528_v41 }
0x12b5   : > { %3231 = vrsqrt.f32 %v2530_v46  ;;  %vm2538_vm0 = vweird.f32 %v2530_v46 }
0x12b8   : > { %v2527_v47 = vpop.xlane.xlu2 %2526 }
0x12b9   : > { %v2529_v50 = vmul.f32 %v2527_v47, %v3388_v10  ;;  %v3152_v10 = vld [vmem:[%s3404_s21 + $0x10] ss:$0 sm:$0xff] }
0x12bb   : > { %v3232_v51 = vpop.eup %3231  ;;  %v2531_v39 = vadd.f32 1e-05, %v2529_v50 }
0x12bc   : > { %v2533_v11 = vmul.f32 %v3232_v51, %v2530_v46  ;;  %vm2539_vm10 = vweird.f32 %v3232_v51 }
0x12bd   : > { %3233 = vrsqrt.f32 %v2531_v39  ;;  %vm2540_vm11 = vmor %vm2538_vm0, %vm2539_vm10  ;;  %vm2548_vm14 = vweird.f32 %v2531_v39 }
0x12be   : > { %v2534_v52 = vmul.f32 %v3232_v51, %v2533_v11 }
0x12c0   : > { %v2535_v13 = vmul.f32 0.5, %v2534_v52 }
0x12c2   : > { %v2536_v31 = vsub.f32 1.5, %v2535_v13 }
0x12c3   : > { %v3234_v53 = vpop.eup %3233 }
0x12c4   : > { %v2537_v23 = vmul.f32 %v3232_v51, %v2536_v31  ;;  %v2543_v48 = vmul.f32 %v3234_v53, %v2531_v39  ;;  %vm2549_vm12 = vweird.f32 %v3234_v53 }
0x12c5   : > { %vm2550_vm15 = vmor %vm2548_vm14, %vm2549_vm12 }
0x12c6   : > { %v2541_v44 = vsel %vm2540_vm11, %v3232_v51, %v2537_v23  ;;  %v2544_v56 = vmul.f32 %v3234_v53, %v2543_v48 }
0x12c7   : > { %v2552_v57 = vmul.f32 %v2541_v44, %v2518_v37 }
0x12c8   : > { %v2545_v58 = vmul.f32 0.5, %v2544_v56 }
0x12c9   : > { %v2555_v62 = vmul.f32 %v2554_v54, %v2552_v57 }
0x12ca   : > { %v2546_v0 = vsub.f32 1.5, %v2545_v58 }
0x12cb   : > { %v2558_v22 = vadd.f32 %v3152_v10, %v2555_v62 }
0x12cc   : > { %v2547_v63 = vmul.f32 %v3234_v53, %v2546_v0 }
0x12cd   : > { %v2560_v1 = vpack.c.bf16 %v2558_v22, %v2558_v22 }
0x12ce   : > { %v2551_v49 = vsel %vm2550_vm15, %v3234_v53, %v2547_v63 }
0x12cf   : > { %2563 = vst.msk [vmem:[%s874_s20] sm:$0xf] %vm2562_vm13, %v2560_v1  ;;  %v2553_v3 = vmul.f32 %v2551_v49, %v2519_v42 }
0x12d1   : > { %v2556_v6 = vmul.f32 %v2554_v54, %v2553_v3 }
0x12d3   : > { %v2559_v7 = vadd.f32 %v3152_v10, %v2556_v6 }
0x12d5   : > { %v2561_v8 = vpack.c.bf16 %v2559_v7, %v2559_v7 }
0x12d7   : > { %2564 = vst.msk [vmem:[%s874_s20 + $0x4] sm:$0xf] %vm2562_vm13, %v2561_v8 }
0x12d8 PF: > { %s3894_s21 = sld [smem:[#allocation3_spill]] }
0x12d9   : > { %s3895_s24 = sld [smem:[#allocation2_spill]] }
0x12da   : > { %s3896_s25 = sld [smem:[#allocation4_spill]] }
0x12de   : > { %s28_s26 = sadd.s32 1, %s3894_s21  }
0x12df   : > { %p25_p5 = scmp.ge.s32.totalorder %s28_s26, 4  }
0x12e1   :  { %27 = sbr.rel (!%p25_p5) target bundleno = 3 (0x3), region = 176 }

</bundles_post_ra>
